<compile_context>
chip_gen: v7x
topology: tpu7x:2x2x1
jax: 0.10.0
libtpu: 0.0.40
codegen_flags: <defaults>
</compile_context>

<pallas_src>
import math
import functools

import jax
import jax.numpy as jnp
from jax.experimental import pallas as pl
from jax.experimental.pallas import tpu as pltpu

EPS = 1e-07
LOG_STD_MAX = 2.0
LOG_STD_MIN = -5.0
MEAN_MAX = 9.0
MEAN_MIN = -9.0


def _round_up(x, m):
    return ((x + m - 1) // m) * m


def _policy_kernel(state_ref, goal_ref, eps_ref,
                   w1_ref, b12_ref, w2_ref, whead_ref, bhead_ref,
                   out_ref):
    wdt = w1_ref.dtype                       # MXU operand dtype (bf16 or f32)
    a_dim = eps_ref.shape[-1]

    # fc1 + relu:  concat([state, goal], -1) @ W1 + b1   (concat done in VMEM)
    x = jnp.concatenate([state_ref[...], goal_ref[...]], axis=-1)
    b12 = b12_ref[...].astype(jnp.float32)   # row 0: b1, row 1: b2
    h = jnp.dot(x.astype(wdt), w1_ref[...], preferred_element_type=jnp.float32)
    h = jnp.maximum(h + b12[0:1, :], 0.0)

    # fc2 + relu
    h = jnp.dot(h.astype(wdt), w2_ref[...], preferred_element_type=jnp.float32)
    h = jnp.maximum(h + b12[1:2, :], 0.0)

    # fused heads: one matmul producing [mu | log_sigma]
    head = jnp.dot(h.astype(wdt), whead_ref[...], preferred_element_type=jnp.float32)
    head = head + bhead_ref[...].astype(jnp.float32)
    mu = jnp.clip(head[:, :a_dim], MEAN_MIN, MEAN_MAX)
    log_sigma = jnp.clip(head[:, a_dim:2 * a_dim], LOG_STD_MIN, LOG_STD_MAX)
    sigma = jnp.exp(log_sigma)

    # rsample of Normal(mu, sigma) + tanh squash
    eps = eps_ref[...]
    z = mu + sigma * eps
    action = jnp.tanh(z)
    tanh_mode = jnp.tanh(mu)

    # Normal log-prob at z:  -eps^2/2 - log(sigma) - 0.5*log(2*pi)
    log_prob_normal = -0.5 * eps * eps - log_sigma - 0.5 * math.log(2.0 * math.pi)
    # TanhTransform log|det J|(z) = 2*(log 2 - z - softplus(-2z))
    log_det = 2.0 * (math.log(2.0) - z - jnp.logaddexp(0.0, -2.0 * z))
    logp = jnp.sum(log_prob_normal - log_det, axis=-1, keepdims=True)   # (TB, 1)

    # Single lane-dense (TB, 128) store: [action | tanh_mode | logp | zero pad]
    tb, out_w = out_ref.shape
    pad_w = out_w - (2 * a_dim + 1)
    pieces = [action, tanh_mode, logp]
    if pad_w > 0:
        pieces.append(jnp.zeros((tb, pad_w), jnp.float32))
    out_ref[...] = jnp.concatenate(pieces, axis=-1)


@functools.partial(jax.jit, static_argnames=("block_b",))
def execute_policy_forward(state, goal, eps, packed, block_b=128):
    """Returns (action, logp_pi, a_tanh_mode)."""
    b = state.shape[0]
    a_dim = eps.shape[-1]
    out_w = _round_up(2 * a_dim + 1, 128)        # lane-dense output slab width
    tb = min(block_b, b)                         # batch tile (mult of 8, or == b)
    grid = (pl.cdiv(b, tb),)

    def batch_block(width):
        return pl.BlockSpec((tb, width), lambda i: (i, 0))

    def resident(arr):
        # Full array as one block; constant index_map keeps it resident in VMEM.
        return pl.BlockSpec(arr.shape, lambda i: (0, 0))

    out = pl.pallas_call(
        _policy_kernel,
        out_shape=jax.ShapeDtypeStruct((b, out_w), jnp.float32),
        grid=grid,
        in_specs=[
            batch_block(state.shape[-1]),        # state
            batch_block(goal.shape[-1]),         # goal
            batch_block(a_dim),                  # eps
            resident(packed["w1"]),              # (2S, H)
            resident(packed["b12"]),             # (2, H)   [b1; b2]
            resident(packed["w2"]),              # (H, H)
            resident(packed["whead"]),           # (H, 2A)  [wmu | wsg]
            resident(packed["bhead"]),           # (1, 2A)  [bmu | bsg]
        ],
        out_specs=batch_block(out_w),
        compiler_params=pltpu.CompilerParams(
            dimension_semantics=("parallel",),   # v7x: shard batch grid over both TCs
        ),
    )(state, goal, eps,
      packed["w1"], packed["b12"], packed["w2"], packed["whead"], packed["bhead"])

    action = out[:, :a_dim]
    a_tanh_mode = out[:, a_dim:2 * a_dim]
    logp_pi = out[:, 2 * a_dim]
    return action, logp_pi, a_tanh_mode


def init_params(key, state_dim, action_dim, hidden_num):
    """Synthetic parameter init. Weights stored (in_features, out_features) so the
    kernel computes x @ W + b (== PyTorch x @ W.T + b with W in transposed layout)."""
    ks = jax.random.split(key, 8)
    in1 = state_dim * 2

    def lin(kw, kb, fan_in, fan_out):
        bound = 1.0 / math.sqrt(fan_in)
        w = jax.random.uniform(kw, (fan_in, fan_out), jnp.float32, -bound, bound)
        b = jax.random.uniform(kb, (1, fan_out), jnp.float32, -bound, bound)
        return w, b

    w1, b1 = lin(ks[0], ks[1], in1, hidden_num)
    w2, b2 = lin(ks[2], ks[3], hidden_num, hidden_num)
    wmu, bmu = lin(ks[4], ks[5], hidden_num, action_dim)
    wsg, bsg = lin(ks[6], ks[7], hidden_num, action_dim)
    return dict(w1=w1, b1=b1, w2=w2, b2=b2, wmu=wmu, bmu=bmu, wsg=wsg, bsg=bsg)


def pack_params(params, matmul_dtype=jnp.bfloat16):
    """One-time packing: fuse head weights/biases, stack fc biases, cast MXU
    operands (weights) to bf16 (use jnp.float32 for exact f32 semantics)."""
    return dict(
        w1=params["w1"].astype(matmul_dtype),                                     # (2S, H)
        w2=params["w2"].astype(matmul_dtype),                                     # (H, H)
        whead=jnp.concatenate([params["wmu"], params["wsg"]], axis=1).astype(matmul_dtype),  # (H, 2A)
        b12=jnp.concatenate([params["b1"], params["b2"]], axis=0).astype(jnp.float32),       # (2, H)
        bhead=jnp.concatenate([params["bmu"], params["bsg"]], axis=1).astype(jnp.float32),   # (1, 2A)
    )


def _reference_forward(state, goal, eps, packed):
    """Pure-JAX mirror of the kernel math (same bf16 MXU operands, f32 elsewhere)."""
    wdt = packed["w1"].dtype
    f32 = jnp.float32
    a_dim = eps.shape[-1]
    x = jnp.concatenate([state, goal], axis=-1)
    b12 = packed["b12"].astype(f32)
    h = jnp.dot(x.astype(wdt), packed["w1"], preferred_element_type=f32) + b12[0:1]
    h = jnp.maximum(h, 0.0)
    h = jnp.dot(h.astype(wdt), packed["w2"], preferred_element_type=f32) + b12[1:2]
    h = jnp.maximum(h, 0.0)
    head = jnp.dot(h.astype(wdt), packed["whead"], preferred_element_type=f32)
    head = head + packed["bhead"].astype(f32)
    mu = jnp.clip(head[:, :a_dim], MEAN_MIN, MEAN_MAX)
    log_sigma = jnp.clip(head[:, a_dim:2 * a_dim], LOG_STD_MIN, LOG_STD_MAX)
    sigma = jnp.exp(log_sigma)
    z = mu + sigma * eps
    action = jnp.tanh(z)
    log_prob_normal = -0.5 * eps * eps - log_sigma - 0.5 * math.log(2.0 * math.pi)
    log_det = 2.0 * (math.log(2.0) - z - jnp.logaddexp(0.0, -2.0 * z))
    logp = jnp.sum(log_prob_normal - log_det, axis=-1)
    return action, logp, jnp.tanh(mu)


if __name__ == "__main__":
    # Small shapes consistent with the module (batch a multiple of 8/128 per review).
    batch, state_dim, action_dim, hidden_num = 256, 8, 4, 256

    key = jax.random.PRNGKey(0)
    k_state, k_goal, k_eps, k_params = jax.random.split(key, 4)

    state = jax.random.normal(k_state, (batch, state_dim), jnp.float32)
    goal = jax.random.normal(k_goal, (batch, state_dim), jnp.float32)
    eps = jax.random.normal(k_eps, (batch, action_dim), jnp.float32)   # N(0,1) noise for rsample
    params = init_params(k_params, state_dim, action_dim, hidden_num)
    packed = pack_params(params)                                       # bf16 MXU weights, f32 biases

    action, logp_pi, a_tanh_mode = execute_policy_forward(state, goal, eps, packed)
    jax.block_until_ready((action, logp_pi, a_tanh_mode))

    assert action.shape == (batch, action_dim)
    assert logp_pi.shape == (batch,)
    assert a_tanh_mode.shape == (batch, action_dim)
    assert bool(jnp.all(jnp.isfinite(action)))
    assert bool(jnp.all(jnp.isfinite(logp_pi)))
    assert bool(jnp.all(jnp.isfinite(a_tanh_mode)))

    # Sanity check against a pure-JAX mirror of the same numerics.
    ref_action, ref_logp, ref_mode = _reference_forward(state, goal, eps, packed)
    assert bool(jnp.allclose(action, ref_action, atol=1e-2, rtol=1e-2))
    assert bool(jnp.allclose(a_tanh_mode, ref_mode, atol=1e-2, rtol=1e-2))
    assert bool(jnp.allclose(logp_pi, ref_logp, atol=1e-2, rtol=1e-2))

    print("KERNEL_OK")
</pallas_src>

<mosaic_0001>
module attributes {stable_mosaic.version = 11 : i64} {
  func.func @_policy_kernel(%arg0: i32, %arg1: memref<128x8xf32, #tpu.memory_space<vmem>>, %arg2: memref<128x8xf32, #tpu.memory_space<vmem>>, %arg3: memref<128x4xf32, #tpu.memory_space<vmem>>, %arg4: memref<16x256xbf16, #tpu.memory_space<vmem>>, %arg5: memref<2x256xf32, #tpu.memory_space<vmem>>, %arg6: memref<256x256xbf16, #tpu.memory_space<vmem>>, %arg7: memref<256x8xbf16, #tpu.memory_space<vmem>>, %arg8: memref<1x8xf32, #tpu.memory_space<vmem>>, %arg9: memref<128x128xf32, #tpu.memory_space<vmem>>) attributes {dimension_semantics = [#tpu.dimension_semantics<parallel>], iteration_bounds = array<i64: 2>, scalar_prefetch = 0 : i64, scratch_operands = 0 : i64, tpu.core_type = #tpu.core_type<tc>, window_params = [{transform_indices = @transform_0, window_bounds = array<i64: 128, 8>}, {transform_indices = @transform_1, window_bounds = array<i64: 128, 8>}, {transform_indices = @transform_2, window_bounds = array<i64: 128, 4>}, {pipeline_mode = #tpu.pipeline_mode<synchronous>, transform_indices = @transform_3, window_bounds = array<i64: 16, 256>}, {pipeline_mode = #tpu.pipeline_mode<synchronous>, transform_indices = @transform_4, window_bounds = array<i64: 2, 256>}, {pipeline_mode = #tpu.pipeline_mode<synchronous>, transform_indices = @transform_5, window_bounds = array<i64: 256, 256>}, {pipeline_mode = #tpu.pipeline_mode<synchronous>, transform_indices = @transform_6, window_bounds = array<i64: 256, 8>}, {pipeline_mode = #tpu.pipeline_mode<synchronous>, transform_indices = @transform_7, window_bounds = array<i64: 1, 8>}, {transform_indices = @transform_8, window_bounds = array<i64: 128, 128>}]} {
    %c0 = arith.constant 0 : index
    %c0_0 = arith.constant 0 : index
    %0 = vector.load %arg1[%c0, %c0_0] : memref<128x8xf32, #tpu.memory_space<vmem>>, vector<128x8xf32>
    %c0_1 = arith.constant 0 : index
    %c0_2 = arith.constant 0 : index
    %1 = vector.load %arg2[%c0_1, %c0_2] : memref<128x8xf32, #tpu.memory_space<vmem>>, vector<128x8xf32>
    %2 = tpu.concatenate %0, %1 in 1 : vector<128x8xf32>, vector<128x8xf32> -> vector<128x16xf32>
    %c0_3 = arith.constant 0 : index
    %c0_4 = arith.constant 0 : index
    %3 = vector.load %arg5[%c0_3, %c0_4] : memref<2x256xf32, #tpu.memory_space<vmem>>, vector<2x256xf32>
    %4 = arith.truncf %2 : vector<128x16xf32> to vector<128x16xbf16>
    %c0_5 = arith.constant 0 : index
    %c0_6 = arith.constant 0 : index
    %5 = vector.load %arg4[%c0_5, %c0_6] : memref<16x256xbf16, #tpu.memory_space<vmem>>, vector<16x256xbf16>
    %cst = arith.constant dense<0.000000e+00> : vector<128x256xf32>
    %6 = tpu.matmul %4, %5, %cst {dimension_numbers = #tpu.dot_dimension_numbers<[1], [0], [0], [1], [0, 0, 1, 1], [], []>} : vector<128x16xbf16>, vector<16x256xbf16>, vector<128x256xf32> -> vector<128x256xf32>
    %7 = vector.extract_strided_slice %3 {offsets = [0, 0], sizes = [1, 256], strides = [1, 1]} : vector<2x256xf32> to vector<1x256xf32>
    %8 = vector.broadcast %7 : vector<1x256xf32> to vector<128x256xf32>
    %9 = arith.addf %6, %8 : vector<128x256xf32>
    %cst_7 = arith.constant 0.000000e+00 : f32
    %10 = vector.broadcast %cst_7 : f32 to vector<128x256xf32>
    %11 = arith.maximumf %9, %10 : vector<128x256xf32>
    %12 = arith.truncf %11 : vector<128x256xf32> to vector<128x256xbf16>
    %c0_8 = arith.constant 0 : index
    %c0_9 = arith.constant 0 : index
    %13 = vector.load %arg6[%c0_8, %c0_9] : memref<256x256xbf16, #tpu.memory_space<vmem>>, vector<256x256xbf16>
    %cst_10 = arith.constant dense<0.000000e+00> : vector<128x256xf32>
    %14 = tpu.matmul %12, %13, %cst_10 {dimension_numbers = #tpu.dot_dimension_numbers<[1], [0], [0], [1], [0, 0, 1, 1], [], []>} : vector<128x256xbf16>, vector<256x256xbf16>, vector<128x256xf32> -> vector<128x256xf32>
    %15 = vector.extract_strided_slice %3 {offsets = [1, 0], sizes = [1, 256], strides = [1, 1]} : vector<2x256xf32> to vector<1x256xf32>
    %16 = vector.broadcast %15 : vector<1x256xf32> to vector<128x256xf32>
    %17 = arith.addf %14, %16 : vector<128x256xf32>
    %cst_11 = arith.constant 0.000000e+00 : f32
    %18 = vector.broadcast %cst_11 : f32 to vector<128x256xf32>
    %19 = arith.maximumf %17, %18 : vector<128x256xf32>
    %20 = arith.truncf %19 : vector<128x256xf32> to vector<128x256xbf16>
    %c0_12 = arith.constant 0 : index
    %c0_13 = arith.constant 0 : index
    %21 = vector.load %arg7[%c0_12, %c0_13] : memref<256x8xbf16, #tpu.memory_space<vmem>>, vector<256x8xbf16>
    %cst_14 = arith.constant dense<0.000000e+00> : vector<128x8xf32>
    %22 = tpu.matmul %20, %21, %cst_14 {dimension_numbers = #tpu.dot_dimension_numbers<[1], [0], [0], [1], [0, 0, 1, 1], [], []>} : vector<128x256xbf16>, vector<256x8xbf16>, vector<128x8xf32> -> vector<128x8xf32>
    %c0_15 = arith.constant 0 : index
    %c0_16 = arith.constant 0 : index
    %23 = vector.load %arg8[%c0_15, %c0_16] : memref<1x8xf32, #tpu.memory_space<vmem>>, vector<1x8xf32>
    %24 = vector.broadcast %23 : vector<1x8xf32> to vector<128x8xf32>
    %25 = arith.addf %22, %24 : vector<128x8xf32>
    %26 = vector.extract_strided_slice %25 {offsets = [0, 0], sizes = [128, 4], strides = [1, 1]} : vector<128x8xf32> to vector<128x4xf32>
    %cst_17 = arith.constant -9.000000e+00 : f32
    %cst_18 = arith.constant 9.000000e+00 : f32
    %27 = vector.broadcast %cst_17 : f32 to vector<128x4xf32>
    %28 = arith.maximumf %27, %26 : vector<128x4xf32>
    %29 = vector.broadcast %cst_18 : f32 to vector<128x4xf32>
    %30 = arith.minimumf %29, %28 : vector<128x4xf32>
    %31 = vector.extract_strided_slice %25 {offsets = [0, 4], sizes = [128, 4], strides = [1, 1]} : vector<128x8xf32> to vector<128x4xf32>
    %cst_19 = arith.constant -5.000000e+00 : f32
    %cst_20 = arith.constant 2.000000e+00 : f32
    %32 = vector.broadcast %cst_19 : f32 to vector<128x4xf32>
    %33 = arith.maximumf %32, %31 : vector<128x4xf32>
    %34 = vector.broadcast %cst_20 : f32 to vector<128x4xf32>
    %35 = arith.minimumf %34, %33 : vector<128x4xf32>
    %36 = math.exp %35 : vector<128x4xf32>
    %c0_21 = arith.constant 0 : index
    %c0_22 = arith.constant 0 : index
    %37 = vector.load %arg3[%c0_21, %c0_22] : memref<128x4xf32, #tpu.memory_space<vmem>>, vector<128x4xf32>
    %38 = arith.mulf %36, %37 : vector<128x4xf32>
    %39 = arith.addf %30, %38 : vector<128x4xf32>
    %40 = math.tanh %39 : vector<128x4xf32>
    %41 = math.tanh %30 : vector<128x4xf32>
    %cst_23 = arith.constant -5.000000e-01 : f32
    %42 = vector.broadcast %cst_23 : f32 to vector<128x4xf32>
    %43 = arith.mulf %42, %37 : vector<128x4xf32>
    %44 = arith.mulf %43, %37 : vector<128x4xf32>
    %45 = arith.subf %44, %35 : vector<128x4xf32>
    %cst_24 = arith.constant 0.918938517 : f32
    %46 = vector.broadcast %cst_24 : f32 to vector<128x4xf32>
    %47 = arith.subf %45, %46 : vector<128x4xf32>
    %cst_25 = arith.constant 0.693147182 : f32
    %48 = vector.broadcast %cst_25 : f32 to vector<128x4xf32>
    %49 = arith.subf %48, %39 : vector<128x4xf32>
    %cst_26 = arith.constant -2.000000e+00 : f32
    %50 = vector.broadcast %cst_26 : f32 to vector<128x4xf32>
    %51 = arith.mulf %50, %39 : vector<128x4xf32>
    %cst_27 = arith.constant 0.000000e+00 : f32
    %52 = vector.broadcast %cst_27 : f32 to vector<128x4xf32>
    %53 = arith.maximumf %52, %51 : vector<128x4xf32>
    %54 = vector.broadcast %cst_27 : f32 to vector<128x4xf32>
    %55 = arith.subf %54, %51 : vector<128x4xf32>
    %56 = arith.cmpf one, %55, %55 : vector<128x4xf32>
    %57 = vector.broadcast %cst_27 : f32 to vector<128x4xf32>
    %58 = arith.addf %57, %51 : vector<128x4xf32>
    %59 = math.absf %55 : vector<128x4xf32>
    %cst_28 = arith.constant 0.000000e+00 : f32
    %60 = vector.broadcast %cst_28 : f32 to vector<128x4xf32>
    %61 = arith.subf %60, %59 : vector<128x4xf32>
    %62 = math.exp %61 : vector<128x4xf32>
    %63 = math.log1p %62 : vector<128x4xf32>
    %64 = arith.addf %53, %63 : vector<128x4xf32>
    %65 = arith.select %56, %58, %64 : vector<128x4xi1>, vector<128x4xf32>
    %66 = arith.subf %49, %65 : vector<128x4xf32>
    %cst_29 = arith.constant 2.000000e+00 : f32
    %67 = vector.broadcast %cst_29 : f32 to vector<128x4xf32>
    %68 = arith.mulf %67, %66 : vector<128x4xf32>
    %69 = arith.subf %47, %68 : vector<128x4xf32>
    %cst_30 = arith.constant dense<0.000000e+00> : vector<128xf32>
    %70 = vector.multi_reduction <add>, %69, %cst_30 [1] : vector<128x4xf32> to vector<128xf32>
    %71 = vector.shape_cast %70 : vector<128xf32> to vector<128x1xf32>
    %cst_31 = arith.constant 0.000000e+00 : f32
    %72 = vector.broadcast %cst_31 : f32 to vector<128x119xf32>
    %73 = tpu.concatenate %40, %41, %71, %72 in 1 : vector<128x4xf32>, vector<128x4xf32>, vector<128x1xf32>, vector<128x119xf32> -> vector<128x128xf32>
    %c0_32 = arith.constant 0 : index
    %c0_33 = arith.constant 0 : index
    %74 = vector.load %arg9[%c0_32, %c0_33] : memref<128x128xf32, #tpu.memory_space<vmem>>, vector<128x128xf32>
    tpu.vector_store %arg9[%c0_32, %c0_33], %73 {strides = array<i32>} : memref<128x128xf32, #tpu.memory_space<vmem>>, vector<128x128xf32>,
    return
  }
  func.func @transform_0(%arg0: i32) -> (i32, i32) {
    %c0_i32 = arith.constant 0 : i32
    %c0_i32_0 = arith.constant 0 : i32
    return %arg0, %c0_i32 : i32, i32
  }
  func.func @transform_1(%arg0: i32) -> (i32, i32) {
    %c0_i32 = arith.constant 0 : i32
    %c0_i32_0 = arith.constant 0 : i32
    return %arg0, %c0_i32 : i32, i32
  }
  func.func @transform_2(%arg0: i32) -> (i32, i32) {
    %c0_i32 = arith.constant 0 : i32
    %c0_i32_0 = arith.constant 0 : i32
    return %arg0, %c0_i32 : i32, i32
  }
  func.func @transform_3(%arg0: i32) -> (i32, i32) {
    %c0_i32 = arith.constant 0 : i32
    %c0_i32_0 = arith.constant 0 : i32
    %c0_i32_1 = arith.constant 0 : i32
    return %c0_i32, %c0_i32_0 : i32, i32
  }
  func.func @transform_4(%arg0: i32) -> (i32, i32) {
    %c0_i32 = arith.constant 0 : i32
    %c0_i32_0 = arith.constant 0 : i32
    %c0_i32_1 = arith.constant 0 : i32
    return %c0_i32, %c0_i32_0 : i32, i32
  }
  func.func @transform_5(%arg0: i32) -> (i32, i32) {
    %c0_i32 = arith.constant 0 : i32
    %c0_i32_0 = arith.constant 0 : i32
    %c0_i32_1 = arith.constant 0 : i32
    return %c0_i32, %c0_i32_0 : i32, i32
  }
  func.func @transform_6(%arg0: i32) -> (i32, i32) {
    %c0_i32 = arith.constant 0 : i32
    %c0_i32_0 = arith.constant 0 : i32
    %c0_i32_1 = arith.constant 0 : i32
    return %c0_i32, %c0_i32_0 : i32, i32
  }
  func.func @transform_7(%arg0: i32) -> (i32, i32) {
    %c0_i32 = arith.constant 0 : i32
    %c0_i32_0 = arith.constant 0 : i32
    %c0_i32_1 = arith.constant 0 : i32
    return %c0_i32, %c0_i32_0 : i32, i32
  }
  func.func @transform_8(%arg0: i32) -> (i32, i32) {
    %c0_i32 = arith.constant 0 : i32
    %c0_i32_0 = arith.constant 0 : i32
    return %arg0, %c0_i32 : i32, i32
  }
}

</mosaic_0001>

<bundles_post_ra>
// kernel: execute_policy_forward.1
= control target key start
LH: loop header
LB: loop body
LE: loop exit
PB: predicated region body
PF: predicated region fallthrough
CT: control target
= control target key end

     0   :  { %s2876_s27 = smov 0   ;;  %s4148_s0 = inlined_call_operand.vmem [shape: f32[256,8], index: 0, kind: input, shape index: {}]   ;;  %s4149_s1 = inlined_call_operand.vmem [shape: f32[256,8], index: 1, kind: input, shape index: {}]   ;;  %s4150_s2 = inlined_call_operand.vmem [shape: f32[256,4], index: 2, kind: input, shape index: {}]   ;;  %s4151_s3 = inlined_call_operand.vmem [shape: bf16[16,256], index: 3, kind: input, shape index: {}]   ;;  %s4152_s4 = inlined_call_operand.vmem [shape: f32[2,256], index: 4, kind: input, shape index: {}]   ;;  %s4153_s5 = inlined_call_operand.vmem [shape: bf16[256,256], index: 5, kind: input, shape index: {}]   ;;  %s4154_s6 = inlined_call_operand.vmem [shape: bf16[256,8], index: 6, kind: input, shape index: {}]   ;;  %s4155_s7 = inlined_call_operand.vmem [shape: f32[1,8], index: 7, kind: input, shape index: {}]   ;;  %s4156_s8 = inlined_call_operand.vmem [shape: f32[256,128], index: 8, kind: output, shape index: {}]  }
   0x1 LB: > { %s2370_s28 = sadd.s32 4294967295, %s2825_s27   ;;  %p2374_p0 = scmp.ge.s32.totalorder %s2825_s27, 1  ;;  %s2825_s27 = sphi %s2876_s27, %s18_s27  }
   0x2   : > { %p285_p1 = scmp.lt.s32.totalorder %s2825_s27, 3 }
   0x4   : > { %p286_p2 = pnand %p2374_p0, %p285_p1 }
   0x6   : > { %289 = sbr.rel (%p286_p2) target bundleno = 1219 (0x4c3), region = 52 }
   0xd   : > { %s2375_s29 = sshll.u32 %s2370_s28, 4  ;;  %v2592_v0 = vld [vmem:[%s4151_s3 + $0x4] ss:$8 sps:$4 sm:$0xff]   ;;  %v2594_v1 = vld [vmem:[%s4151_s3] ss:$8 sps:$4 sm:$0xff]   ;;  %v2827_v2 = vmov 0  }
   0xe   : > { %p330_p3 = scmp.lt.s32.totalorder %s2375_s29, 31  ;;  %564 = vmatprep.mubr.bf16.mxu0 %v2827_v2  ;;  %532 = vmatprep.subr.bf16.mxu0 %v2592_v0  ;;  %s2828_s16 = smov 8   ;;  %v2595_v27 = vld [vmem:[%s4153_s5 + $0x4] ss:$8 sps:$4 sm:$0xff]   ;;  %v2597_v28 = vld [vmem:[%s4153_s5] ss:$8 sps:$4 sm:$0xff]  }
   0xf   : > { %533 = vmatpush1.bf16.msra.mxu0 %v2594_v1  ;;  %v2598_v29 = vld [vmem:[%s4153_s5 + $0x14] ss:$8 sps:$4 sm:$0xff]   ;;  %903 = vmatprep.subr.bf16.mxu1 %v2595_v27  ;;  %v2600_v30 = vld [vmem:[%s4153_s5 + $0x10] ss:$8 sps:$4 sm:$0xff]   ;;  %v2601_v31 = vld [vmem:[%s4153_s5 + $0x24] ss:$8 sps:$4 sm:$0xff]  }
  0x10   : > { %s4310_s29 = smov (!%p330_p3, %s2375_s29), 31  ;;  %904 = vmatpush1.bf16.msra.mxu1 %v2597_v28  ;;  %v2603_v32 = vld [vmem:[%s4153_s5 + $0x20] ss:$8 sps:$4 sm:$0xff]   ;;  %v2604_v33 = vld [vmem:[%s4153_s5 + $0x34] ss:$8 sps:$4 sm:$0xff]   ;;  %vm450_vm0 = vcmask 64512  }
  0x11   : > { %s2891_s12 = sshll.u32 %s4310_s29, 3  ;;  %905 = vmatprep.subr.bf16.mxu1 %v2598_v29  ;;  %v2606_v34 = vld [vmem:[%s4153_s5 + $0x30] ss:$8 sps:$4 sm:$0xff]   ;;  %v2607_v35 = vld [vmem:[%s4153_s5 + $0x44] ss:$8 sps:$4 sm:$0xff]   ;;  %vm507_vm1 = vcmask 130048  }
  0x12   : > { %s339_s15 = scalar_lea.vmem %s4149_s1, %s2891_s12  ;;  %v2609_v36 = vld [vmem:[%s4153_s5 + $0x40] ss:$8 sps:$4 sm:$0xff]   ;;  %v2610_v37 = vld [vmem:[%s4153_s5 + $0x54] ss:$8 sps:$4 sm:$0xff]   ;;  %v2612_v38 = vld [vmem:[%s4153_s5 + $0x50] ss:$8 sps:$4 sm:$0xff]   ;;  %s2982_s13 = scalar_lea.vmem %s4148_s0, %s2891_s12 }
  0x13   : > { %v370_v3 = vld [vmem:[%s339_s15] sm:$0xff]  ;;  %v371_v4 = vld [vmem:[%s339_s15 + $0x8] sm:$0xff]  ;;  %v372_v5 = vld [vmem:[%s339_s15 + $0x10] sm:$0xff]  ;;  %s3145_s20 = scalar_lea.vmem %s4150_s2, %s2891_s12  ;;  %s2829_s21 = smov 4   ;;  %vm2112_vm5 = vcmask 31744  }
  0x14   : > { %v2552_v6 = vpack.i.bf16 %v371_v4, %v370_v3  ;;  %v373_v7 = vld [vmem:[%s339_s15 + $0x18] sm:$0xff]  ;;  %v374_v8 = vld [vmem:[%s339_s15 + $0x20] sm:$0xff]  ;;  %v375_v9 = vld [vmem:[%s339_s15 + $0x28] sm:$0xff]  ;;  %906 = vmatpush1.bf16.msra.mxu1 %v2600_v30  ;;  %s2830_s24 = smov 124   ;;  %s4058_s28 = scalar_lea.vmem %s4156_s8, %s2891_s12 }
  0x15   : > { %v2562_v10 = vpack.i.bf16 %v375_v9, %v374_v8  ;;  %v376_v11 = vld [vmem:[%s339_s15 + $0x30] sm:$0xff]  ;;  %v377_v12 = vld [vmem:[%s339_s15 + $0x38] sm:$0xff]  ;;  %v2557_v13 = vpack.i.bf16 %v373_v7, %v372_v5  ;;  %v378_v15 = vld [vmem:[%s339_s15 + $0x40] sm:$0xff]  ;;  %907 = vmatprep.subr.bf16.mxu1 %v2601_v31 }
  0x16   : > { %2553 = vrot.lane.b32.xlu0 %v2552_v6, %s2828_s16  ;;  %v2567_v14 = vpack.i.bf16 %v377_v12, %v376_v11  ;;  %v379_v16 = vld [vmem:[%s339_s15 + $0x48] sm:$0xff]  ;;  %v380_v17 = vld [vmem:[%s339_s15 + $0x50] sm:$0xff]  ;;  %v381_v18 = vld [vmem:[%s339_s15 + $0x58] sm:$0xff] }
  0x17   : > { %2563 = vrot.lane.b32.xlu1 %v2562_v10, %s2828_s16  ;;  %v382_v19 = vld [vmem:[%s339_s15 + $0x60] sm:$0xff]  ;;  %v383_v20 = vld [vmem:[%s339_s15 + $0x68] sm:$0xff]  ;;  %v2572_v21 = vpack.i.bf16 %v379_v16, %v378_v15  ;;  %v384_v22 = vld [vmem:[%s339_s15 + $0x70] sm:$0xff]  ;;  %v2577_v24 = vpack.i.bf16 %v381_v18, %v380_v17 }
  0x18   : > { %v385_v23 = vld [vmem:[%s339_s15 + $0x78] sm:$0xff]  ;;  %v2582_v25 = vpack.i.bf16 %v383_v20, %v382_v19  ;;  %908 = vmatpush1.bf16.msra.mxu1 %v2603_v32  ;;  %v2613_v39 = vld [vmem:[%s4153_s5 + $0x64] ss:$8 sps:$4 sm:$0xff]   ;;  %v2615_v40 = vld [vmem:[%s4153_s5 + $0x60] ss:$8 sps:$4 sm:$0xff]  }
  0x19   : > { %v2587_v26 = vpack.i.bf16 %v385_v23, %v384_v22  ;;  %909 = vmatprep.subr.bf16.mxu1 %v2604_v33  ;;  %v2616_v41 = vld [vmem:[%s4153_s5 + $0x74] ss:$8 sps:$4 sm:$0xff]   ;;  %v2618_v42 = vld [vmem:[%s4153_s5 + $0x70] ss:$8 sps:$4 sm:$0xff]   ;;  %v2619_v43 = vld [vmem:[%s4153_s5 + $0x84] ss:$8 sps:$4 sm:$0xff]  }
  0x1a   : > { %2558 = vrot.lane.b32.xlu0 %v2557_v13, %s2828_s16  ;;  %v2621_v44 = vld [vmem:[%s4153_s5 + $0x80] ss:$8 sps:$4 sm:$0xff]   ;;  %v2622_v45 = vld [vmem:[%s4153_s5 + $0x94] ss:$8 sps:$4 sm:$0xff]   ;;  %v2624_v46 = vld [vmem:[%s4153_s5 + $0x90] ss:$8 sps:$4 sm:$0xff]  }
  0x1b   : > { %2568 = vrot.lane.b32.xlu1 %v2567_v14, %s2828_s16  ;;  %v2625_v47 = vld [vmem:[%s4153_s5 + $0xa4] ss:$8 sps:$4 sm:$0xff]   ;;  %v2627_v48 = vld [vmem:[%s4153_s5 + $0xa0] ss:$8 sps:$4 sm:$0xff]   ;;  %v2628_v49 = vld [vmem:[%s4153_s5 + $0xb4] ss:$8 sps:$4 sm:$0xff]  }
  0x1c   : > { %910 = vmatpush1.bf16.msra.mxu1 %v2606_v34  ;;  %v2630_v50 = vld [vmem:[%s4153_s5 + $0xb0] ss:$8 sps:$4 sm:$0xff]   ;;  %v2631_v51 = vld [vmem:[%s4153_s5 + $0xc4] ss:$8 sps:$4 sm:$0xff]   ;;  %v2633_v52 = vld [vmem:[%s4153_s5 + $0xc0] ss:$8 sps:$4 sm:$0xff]  }
  0x1d   : > { %911 = vmatprep.subr.bf16.mxu1 %v2607_v35  ;;  %v2634_v53 = vld [vmem:[%s4153_s5 + $0xd4] ss:$8 sps:$4 sm:$0xff]   ;;  %v354_v55 = vld [vmem:[%s2982_s13] sm:$0xff]  ;;  %v355_v56 = vld [vmem:[%s2982_s13 + $0x8] sm:$0xff] }
  0x1e   : > { %2573 = vrot.lane.b32.xlu0 %v2572_v21, %s2828_s16  ;;  %v356_v63 = vld [vmem:[%s2982_s13 + $0x10] sm:$0xff]  ;;  %v357_v0 = vld [vmem:[%s2982_s13 + $0x18] sm:$0xff]  ;;  %v358_v10 = vld [vmem:[%s2982_s13 + $0x20] sm:$0xff] }
  0x1f   : > { %2578 = vrot.lane.b32.xlu1 %v2577_v24, %s2828_s16  ;;  %v359_v11 = vld [vmem:[%s2982_s13 + $0x28] sm:$0xff]  ;;  %v360_v18 = vld [vmem:[%s2982_s13 + $0x30] sm:$0xff]  ;;  %v361_v19 = vld [vmem:[%s2982_s13 + $0x38] sm:$0xff] }
  0x20   : > { %912 = vmatpush1.bf16.msra.mxu1 %v2609_v36  ;;  %v363_v27 = vld [vmem:[%s2982_s13 + $0x48] sm:$0xff]  ;;  %v364_v34 = vld [vmem:[%s2982_s13 + $0x50] sm:$0xff]  ;;  %v365_v35 = vld [vmem:[%s2982_s13 + $0x58] sm:$0xff] }
  0x21   : > { %913 = vmatprep.subr.bf16.mxu1 %v2610_v37 }
  0x22   : > { %2583 = vrot.lane.b32.xlu0 %v2582_v25, %s2828_s16 }
  0x23   : > { %2588 = vrot.lane.b32.xlu1 %v2587_v26, %s2828_s16  ;;  %v362_v26 = vld [vmem:[%s2982_s13 + $0x40] sm:$0xff] }
  0x24   : > { %914 = vmatpush1.bf16.msra.mxu1 %v2612_v38 }
  0x25   : > { %915 = vmatprep.subr.bf16.mxu1 %v2613_v39 }
  0x28   : > { %916 = vmatpush1.bf16.msra.mxu1 %v2615_v40 }
  0x29   : > { %917 = vmatprep.subr.bf16.mxu1 %v2616_v41 }
  0x2c   : > { %918 = vmatpush1.bf16.msra.mxu1 %v2618_v42  ;;  %v366_v42 = vld [vmem:[%s2982_s13 + $0x60] sm:$0xff] }
  0x2d   : > { %919 = vmatprep.subr.bf16.mxu1 %v2619_v43  ;;  %v367_v43 = vld [vmem:[%s2982_s13 + $0x68] sm:$0xff] }
  0x30   : > { %920 = vmatpush1.bf16.msra.mxu1 %v2621_v44 }
  0x31   : > { %921 = vmatprep.subr.bf16.mxu1 %v2622_v45 }
  0x34   : > { %922 = vmatpush1.bf16.msra.mxu1 %v2624_v46 }
  0x35   : > { %923 = vmatprep.subr.bf16.mxu1 %v2625_v47 }
  0x38   : > { %924 = vmatpush1.bf16.msra.mxu1 %v2627_v48 }
  0x39   : > { %925 = vmatprep.subr.bf16.mxu1 %v2628_v49 }
  0x3c   : > { %926 = vmatpush1.bf16.msra.mxu1 %v2630_v50  ;;  %v368_v50 = vld [vmem:[%s2982_s13 + $0x70] sm:$0xff] }
  0x3d   : > { %927 = vmatprep.subr.bf16.mxu1 %v2631_v51  ;;  %v369_v51 = vld [vmem:[%s2982_s13 + $0x78] sm:$0xff] }
  0x40   : > { %928 = vmatpush1.bf16.msra.mxu1 %v2633_v52 }
  0x41   : > { %929 = vmatprep.subr.bf16.mxu1 %v2634_v53 }
  0x88   : > { %v2554_v54 = vpop.permute.xlu0 %2553 }
  0x89   : > { %v2556_v57 = vunpack.i.h.bf16 %v2554_v54  ;;  %v2555_v58 = vunpack.i.l.bf16 %v2554_v54  ;;  %v2564_v6 = vpop.permute.xlu1 %2563 }
  0x8a   : > { %v2566_v8 = vunpack.i.h.bf16 %v2564_v6  ;;  %v2565_v9 = vunpack.i.l.bf16 %v2564_v6  ;;  %v2653_v6 = vld [vmem:[%s4154_s6 + $0x68] sm:$0xff]  }
  0x8b   : > { %v451_v59 = vsel %vm450_vm0, %v354_v55, %v2555_v58  ;;  %v452_v60 = vsel %vm450_vm0, %v355_v56, %v2556_v57  ;;  %v2636_v55 = vld [vmem:[%s4153_s5 + $0xd0] ss:$8 sps:$4 sm:$0xff]   ;;  %v2637_v56 = vld [vmem:[%s4153_s5 + $0xe4] ss:$8 sps:$4 sm:$0xff]   ;;  %v2639_v57 = vld [vmem:[%s4153_s5 + $0xe0] ss:$8 sps:$4 sm:$0xff]  }
  0x8c   : > { %v468_v61 = vpack.c.bf16 %v452_v60, %v451_v59  ;;  %v2559_v62 = vpop.permute.xlu0 %2558  ;;  %v455_v12 = vsel %vm450_vm0, %v358_v10, %v2565_v9  ;;  %v456_v13 = vsel %vm450_vm0, %v359_v11, %v2566_v8  ;;  %930 = vmatpush1.bf16.msra.mxu1 %v2636_v55  ;;  %v2642_v58 = vld [vmem:[%s4153_s5 + $0xf0] ss:$8 sps:$4 sm:$0xff]   ;;  %v2643_v59 = vld [vmem:[%s4154_s6 + $0x40] sm:$0xff]   ;;  %v479_v10 = vlaneseq }
  0x8d   : > { %v2561_v1 = vunpack.i.h.bf16 %v2559_v62  ;;  %v2560_v3 = vunpack.i.l.bf16 %v2559_v62  ;;  %v2569_v14 = vpop.permute.xlu1 %2568  ;;  %v470_v15 = vpack.c.bf16 %v456_v13, %v455_v12  ;;  %931 = vmatprep.subr.bf16.mxu1 %v2637_v56  ;;  %v2644_v60 = vld [vmem:[%s4154_s6] sm:$0xff]   ;;  %2476 = vmatprep.subr.bf16.mxu0 %v2643_v59  ;;  %v2646_v62 = vld [vmem:[%s4154_s6 + $0x8] sm:$0xff]   ;;  %v2655_v8 = vld [vmem:[%s4154_s6 + $0x70] sm:$0xff]  }
  0x8e   : > { %2385 = vmatmul.mubr.msk.bf16.vlgmr.msra.gmra.mrb[0].mxu0 %vm507_vm1, %v468_v61  ;;  %v2571_v16 = vunpack.i.h.bf16 %v2569_v14  ;;  %v2570_v17 = vunpack.i.l.bf16 %v2569_v14  ;;  %v2645_v61 = vld [vmem:[%s4154_s6 + $0x48] sm:$0xff]   ;;  %v2656_v9 = vld [vmem:[%s4154_s6 + $0x30] sm:$0xff]   ;;  %v3088_v11 = vshrl.u32 %v479_v10, 7  ;;  %v3094_v13 = vld [vmem:[%s4152_s4] sm:$0xf] }
  0x8f   : > { %v453_v4 = vsel %vm450_vm0, %v356_v63, %v2560_v3  ;;  %v454_v5 = vsel %vm450_vm0, %v357_v0, %v2561_v1  ;;  %574 = vmatprep.mubr.bf16.mxu0 %v2827_v2  ;;  %2477 = vmatpush3.bf16.msra.mxu0 %v2644_v60  ;;  %v2647_v63 = vld [vmem:[%s4154_s6 + $0x50] sm:$0xff]   ;;  %v2649_v1 = vld [vmem:[%s4154_s6 + $0x58] sm:$0xff]  }
  0x90   : > { %v469_v7 = vpack.c.bf16 %v454_v5, %v453_v4  ;;  %v457_v20 = vsel %vm450_vm0, %v360_v18, %v2570_v17  ;;  %v458_v21 = vsel %vm450_vm0, %v361_v19, %v2571_v16  ;;  %v2574_v22 = vpop.permute.xlu0 %2573  ;;  %932 = vmatpush1.bf16.msra.mxu1 %v2639_v57  ;;  %2478 = vmatprep.subr.bf16.mxu0 %v2645_v61  ;;  %v2648_v0 = vld [vmem:[%s4154_s6 + $0x10] sm:$0xff]   ;;  %v2650_v3 = vld [vmem:[%s4154_s6 + $0x18] sm:$0xff]   ;;  %v2651_v4 = vld [vmem:[%s4154_s6 + $0x60] sm:$0xff]   ;;  %v481_v12 = vsub.s32 0, %v3088_v11 }
  0x91   : > { %v471_v23 = vpack.c.bf16 %v458_v21, %v457_v20  ;;  %v2576_v24 = vunpack.i.h.bf16 %v2574_v22  ;;  %v2575_v25 = vunpack.i.l.bf16 %v2574_v22  ;;  %v2579_v30 = vpop.permute.xlu1 %2578  ;;  %v2652_v5 = vld [vmem:[%s4154_s6 + $0x20] sm:$0xff]   ;;  %v485_v14 = vsub.s32 2, %v3088_v11 }
  0x92   : > { %v2581_v32 = vunpack.i.h.bf16 %v2579_v30  ;;  %v2580_v33 = vunpack.i.l.bf16 %v2579_v30 }
  0x93   : > { %v459_v28 = vsel %vm450_vm0, %v362_v26, %v2575_v25  ;;  %v460_v29 = vsel %vm450_vm0, %v363_v27, %v2576_v24  ;;  %2479 = vmatpush3.bf16.msra.mxu0 %v2646_v62  ;;  %v486_v16 = vrot.slane %v3094_v13, %v485_v14 }
  0x94   : > { %v472_v31 = vpack.c.bf16 %v460_v29, %v459_v28  ;;  %v461_v36 = vsel %vm450_vm0, %v364_v34, %v2580_v33  ;;  %v462_v37 = vsel %vm450_vm0, %v365_v35, %v2581_v32  ;;  %v2584_v38 = vpop.permute.xlu0 %2583  ;;  %2480 = vmatprep.subr.bf16.mxu0 %v2647_v63 }
  0x95   : > { %v473_v39 = vpack.c.bf16 %v462_v37, %v461_v36  ;;  %v2586_v40 = vunpack.i.h.bf16 %v2584_v38  ;;  %v2585_v41 = vunpack.i.l.bf16 %v2584_v38  ;;  %v2589_v46 = vpop.permute.xlu1 %2588  ;;  %v3101_v18 = vrot.slane %v486_v16, %v481_v12 }
  0x96   : > { %2386 = vmatmul.mubr.msk.bf16.gmra.mrb[4].mxu0 %vm507_vm1, %v469_v7  ;;  %v2591_v48 = vunpack.i.h.bf16 %v2589_v46  ;;  %v2590_v49 = vunpack.i.l.bf16 %v2589_v46  ;;  %v2654_v7 = vld [vmem:[%s4154_s6 + $0x28] sm:$0xff]  }
  0x97   : > { %584 = vmatprep.mubr.bf16.mxu0 %v2827_v2  ;;  %v463_v44 = vsel %vm450_vm0, %v366_v42, %v2585_v41  ;;  %v464_v45 = vsel %vm450_vm0, %v367_v43, %v2586_v40  ;;  %2481 = vmatpush3.bf16.msra.mxu0 %v2648_v0 }
  0x98   : > { %v474_v47 = vpack.c.bf16 %v464_v45, %v463_v44  ;;  %v465_v52 = vsel %vm450_vm0, %v368_v50, %v2590_v49  ;;  %v466_v53 = vsel %vm450_vm0, %v369_v51, %v2591_v48  ;;  %2482 = vmatprep.subr.bf16.mxu0 %v2649_v1 }
  0x99   : > { %v475_v54 = vpack.c.bf16 %v466_v53, %v465_v52 }
  0x9b   : > { %2483 = vmatpush3.bf16.msra.mxu0 %v2650_v3 }
  0x9c   : > { %2484 = vmatprep.subr.bf16.mxu0 %v2651_v4 }
  0x9e   : > { %2387 = vmatmul.mubr.msk.bf16.gmra.mrb[8].mxu0 %vm507_vm1, %v470_v15  ;;  %v482_v15 = vrot.slane %v3094_v13, %v481_v12 }
  0x9f   : > { %594 = vmatprep.mubr.bf16.mxu0 %v2827_v2  ;;  %2485 = vmatpush3.bf16.msra.mxu0 %v2652_v5 }
  0xa0   : > { %2486 = vmatprep.subr.bf16.mxu0 %v2653_v6  ;;  %v3099_v17 = vrot.slane %v482_v15, %v481_v12 }
  0xa3   : > { %2487 = vmatpush3.bf16.msra.mxu0 %v2654_v7 }
  0xa4   : > { %2488 = vmatprep.subr.bf16.mxu0 %v2655_v8 }
  0xa6   : > { %2388 = vmatmul.mubr.msk.bf16.gmra.mrb[12].mxu0 %vm507_vm1, %v471_v23 }
  0xa7   : > { %604 = vmatprep.mubr.bf16.mxu0 %v2827_v2  ;;  %2489 = vmatpush3.bf16.msra.mxu0 %v2656_v9 }
  0xae   : > { %2389 = vmatmul.mubr.msk.bf16.gmra.mrb[16].mxu0 %vm507_vm1, %v472_v31 }
  0xaf   : > { %614 = vmatprep.mubr.bf16.mxu0 %v2827_v2 }
  0xb6   : > { %2390 = vmatmul.mubr.msk.bf16.gmra.mrb[20].mxu0 %vm507_vm1, %v473_v39 }
  0xb7   : > { %624 = vmatprep.mubr.bf16.mxu0 %v2827_v2 }
  0xbe   : > { %2391 = vmatmul.mubr.msk.bf16.gmra.mrb[24].mxu0 %vm507_vm1, %v474_v47 }
  0xbf   : > { %634 = vmatprep.mubr.bf16.mxu0 %v2827_v2  ;;  %v2640_v2 = vld [vmem:[%s4153_s5 + $0xf4] ss:$8 sps:$4 sm:$0xff]  }
  0xc0   : > { %933 = vmatprep.subr.bf16.mxu1 %v2640_v2 }
  0xc1   : > { %934 = vmatpush1.bf16.msra.mxu1 %v2642_v58 }
  0xc6   : > { %2392 = vmatmul.mubr.msk.bf16.gmra.mrb[28].mxu0 %vm507_vm1, %v475_v54 }
 0x161   : > { %v566_v19 = vpop.f32.mrb[0].mxu0 }
 0x162   : > { %v567_v20 = vadd.f32 %v566_v19, %v3099_v17  ;;  %v568_v21 = vpop.f32.mrb[1].mxu0 }
 0x163   : > { %v569_v22 = vadd.f32 %v568_v21, %v3101_v18  ;;  %v570_v23 = vpop.f32.mrb[2].mxu0 }
 0x164   : > { %v571_v24 = vadd.f32 %v570_v23, %v3099_v17  ;;  %v572_v25 = vpop.f32.mrb[3].mxu0  ;;  %v645_v27 = vmax.f32 %v567_v20, 0.0 }
 0x165   : > { %v573_v26 = vadd.f32 %v572_v25, %v3101_v18  ;;  %v646_v29 = vmax.f32 %v569_v22, 0.0 }
 0x166   : > { %v647_v28 = vmax.f32 %v571_v24, 0.0 }
 0x167   : > { %v648_v30 = vmax.f32 %v573_v26, 0.0 }
 0x168   : > { %v677_v31 = vpack.c.bf16 %v647_v28, %v645_v27 }
 0x169   : > { %v576_v32 = vpop.f32.mrb[4].mxu0  ;;  %v678_v33 = vpack.c.bf16 %v648_v30, %v646_v29 }
 0x16a   : > { %v577_v34 = vadd.f32 %v576_v32, %v3099_v17  ;;  %v578_v35 = vpop.f32.mrb[5].mxu0 }
 0x16b   : > { %v579_v36 = vadd.f32 %v578_v35, %v3101_v18  ;;  %v580_v37 = vpop.f32.mrb[6].mxu0  ;;  %935 = vmatprep.mubr.bf16.mxu1 %v678_v33 }
 0x16c   : > { %v581_v38 = vadd.f32 %v580_v37, %v3099_v17  ;;  %v582_v39 = vpop.f32.mrb[7].mxu0  ;;  %936 = vmatmul.mubr.bf16.vlgmr.msra.gmra.mrb[0].mxu1 %v677_v31  ;;  %v649_v41 = vmax.f32 %v577_v34, 0.0 }
 0x16d   : > { %v583_v40 = vadd.f32 %v582_v39, %v3101_v18  ;;  %v650_v43 = vmax.f32 %v579_v36, 0.0 }
 0x16e   : > { %v651_v42 = vmax.f32 %v581_v38, 0.0 }
 0x16f   : > { %v652_v44 = vmax.f32 %v583_v40, 0.0 }
 0x170   : > { %v679_v45 = vpack.c.bf16 %v651_v42, %v649_v41 }
 0x171   : > { %v680_v46 = vpack.c.bf16 %v652_v44, %v650_v43  ;;  %v586_v47 = vpop.f32.mrb[8].mxu0 }
 0x172   : > { %v587_v48 = vadd.f32 %v586_v47, %v3099_v17  ;;  %v588_v49 = vpop.f32.mrb[9].mxu0 }
 0x173   : > { %v589_v50 = vadd.f32 %v588_v49, %v3101_v18  ;;  %v590_v51 = vpop.f32.mrb[10].mxu0  ;;  %945 = vmatprep.mubr.bf16.mxu1 %v680_v46 }
 0x174   : > { %v591_v52 = vadd.f32 %v590_v51, %v3099_v17  ;;  %v592_v53 = vpop.f32.mrb[11].mxu0  ;;  %946 = vmatmul.mubr.bf16.gmra.mrb[4].mxu1 %v679_v45  ;;  %v653_v55 = vmax.f32 %v587_v48, 0.0 }
 0x175   : > { %v593_v54 = vadd.f32 %v592_v53, %v3101_v18  ;;  %v654_v57 = vmax.f32 %v589_v50, 0.0 }
 0x176   : > { %v655_v56 = vmax.f32 %v591_v52, 0.0 }
 0x177   : > { %v656_v2 = vmax.f32 %v593_v54, 0.0 }
 0x178   : > { %v681_v58 = vpack.c.bf16 %v655_v56, %v653_v55 }
 0x179   : > { %v682_v59 = vpack.c.bf16 %v656_v2, %v654_v57  ;;  %v596_v60 = vpop.f32.mrb[12].mxu0 }
 0x17a   : > { %v597_v61 = vadd.f32 %v596_v60, %v3099_v17  ;;  %v598_v62 = vpop.f32.mrb[13].mxu0 }
 0x17b   : > { %v599_v63 = vadd.f32 %v598_v62, %v3101_v18  ;;  %v600_v0 = vpop.f32.mrb[14].mxu0  ;;  %955 = vmatprep.mubr.bf16.mxu1 %v682_v59 }
 0x17c   : > { %v601_v1 = vadd.f32 %v600_v0, %v3099_v17  ;;  %v602_v3 = vpop.f32.mrb[15].mxu0  ;;  %956 = vmatmul.mubr.bf16.gmra.mrb[8].mxu1 %v681_v58  ;;  %v657_v5 = vmax.f32 %v597_v61, 0.0 }
 0x17d   : > { %v603_v4 = vadd.f32 %v602_v3, %v3101_v18  ;;  %v658_v7 = vmax.f32 %v599_v63, 0.0 }
 0x17e   : > { %v659_v6 = vmax.f32 %v601_v1, 0.0 }
 0x17f   : > { %v660_v8 = vmax.f32 %v603_v4, 0.0 }
 0x180   : > { %v683_v9 = vpack.c.bf16 %v659_v6, %v657_v5 }
 0x181   : > { %v684_v10 = vpack.c.bf16 %v660_v8, %v658_v7  ;;  %v606_v12 = vpop.f32.mrb[16].mxu0  ;;  %v2657_v7 = vld [vmem:[%s4154_s6 + $0x78] sm:$0xff]   ;;  %v3151_v8 = vld [vmem:[%s3145_s20 + $0x8] sm:$0xff] }
 0x182   : > { %v607_v14 = vadd.f32 %v606_v12, %v3099_v17  ;;  %v608_v15 = vpop.f32.mrb[17].mxu0  ;;  %2490 = vmatprep.subr.bf16.mxu0 %v2657_v7  ;;  %1426 = vrot.lane.b32.xlu1 %v3151_v8, %s2829_s21  ;;  %v3168_v12 = vld [vmem:[%s3145_s20 + $0x20] sm:$0xff] }
 0x183   : > { %v609_v16 = vadd.f32 %v608_v15, %v3101_v18  ;;  %v610_v19 = vpop.f32.mrb[18].mxu0  ;;  %965 = vmatprep.mubr.bf16.mxu1 %v684_v10  ;;  %v3161_v10 = vld [vmem:[%s3145_s20 + $0x18] sm:$0xff]  ;;  %v3178_v15 = vld [vmem:[%s3145_s20 + $0x30] sm:$0xff] }
 0x184   : > { %v611_v20 = vadd.f32 %v610_v19, %v3099_v17  ;;  %v612_v21 = vpop.f32.mrb[19].mxu0  ;;  %966 = vmatmul.mubr.bf16.gmra.mrb[12].mxu1 %v683_v9  ;;  %v661_v23 = vmax.f32 %v607_v14, 0.0  ;;  %v3158_v9 = vld [vmem:[%s3145_s20 + $0x10] sm:$0xff]  ;;  %v3171_v14 = vld [vmem:[%s3145_s20 + $0x28] sm:$0xff]  ;;  %v3188_v19 = vld [vmem:[%s3145_s20 + $0x40] sm:$0xff] }
 0x185   : > { %v613_v22 = vadd.f32 %v612_v21, %v3101_v18  ;;  %v662_v25 = vmax.f32 %v609_v16, 0.0  ;;  %v3181_v16 = vld [vmem:[%s3145_s20 + $0x38] sm:$0xff]  ;;  %v3198_v21 = vld [vmem:[%s3145_s20 + $0x50] sm:$0xff] }
 0x186   : > { %v663_v24 = vmax.f32 %v611_v20, 0.0  ;;  %1430 = vrot.lane.b32.xlu1 %v3161_v10, %s2829_s21  ;;  %v3191_v20 = vld [vmem:[%s3145_s20 + $0x48] sm:$0xff] }
 0x187   : > { %v664_v26 = vmax.f32 %v613_v22, 0.0  ;;  %v3201_v22 = vld [vmem:[%s3145_s20 + $0x58] sm:$0xff] }
 0x188   : > { %v685_v27 = vpack.c.bf16 %v663_v24, %v661_v23  ;;  %v3208_v23 = vld [vmem:[%s3145_s20 + $0x60] sm:$0xff]  ;;  %v3211_v24 = vld [vmem:[%s3145_s20 + $0x68] sm:$0xff] }
 0x189   : > { %v686_v28 = vpack.c.bf16 %v664_v26, %v662_v25  ;;  %v616_v29 = vpop.f32.mrb[20].mxu0  ;;  %v3218_v25 = vld [vmem:[%s3145_s20 + $0x70] sm:$0xff]  ;;  %v3221_v26 = vld [vmem:[%s3145_s20 + $0x78] sm:$0xff] }
 0x18a   : > { %v617_v30 = vadd.f32 %v616_v29, %v3099_v17  ;;  %v618_v31 = vpop.f32.mrb[21].mxu0  ;;  %1434 = vrot.lane.b32.xlu1 %v3171_v14, %s2829_s21 }
 0x18b   : > { %v619_v32 = vadd.f32 %v618_v31, %v3101_v18  ;;  %v620_v33 = vpop.f32.mrb[22].mxu0  ;;  %975 = vmatprep.mubr.bf16.mxu1 %v686_v28  ;;  %v731_v28 = vsub.s32 3, %v3088_v11 }
 0x18c   : > { %v621_v34 = vadd.f32 %v620_v33, %v3099_v17  ;;  %v622_v35 = vpop.f32.mrb[23].mxu0  ;;  %976 = vmatmul.mubr.bf16.gmra.mrb[16].mxu1 %v685_v27  ;;  %v665_v37 = vmax.f32 %v617_v30, 0.0  ;;  %v727_v27 = vsub.s32 1, %v3088_v11 }
 0x18d   : > { %v623_v36 = vadd.f32 %v622_v35, %v3101_v18  ;;  %v666_v39 = vmax.f32 %v619_v32, 0.0  ;;  %v732_v30 = vrot.slane %v3094_v13, %v731_v28 }
 0x18e   : > { %v667_v38 = vmax.f32 %v621_v34, 0.0  ;;  %1438 = vrot.lane.b32.xlu1 %v3181_v16, %s2829_s21  ;;  %v728_v29 = vrot.slane %v3094_v13, %v727_v27 }
 0x18f   : > { %v668_v40 = vmax.f32 %v623_v36, 0.0  ;;  %v3233_v32 = vrot.slane %v732_v30, %v727_v27 }
 0x190   : > { %v687_v41 = vpack.c.bf16 %v667_v38, %v665_v37  ;;  %v3231_v31 = vrot.slane %v728_v29, %v727_v27 }
 0x191   : > { %v688_v42 = vpack.c.bf16 %v668_v40, %v666_v39  ;;  %v626_v43 = vpop.f32.mrb[24].mxu0 }
 0x192   : > { %v627_v44 = vadd.f32 %v626_v43, %v3099_v17  ;;  %v628_v45 = vpop.f32.mrb[25].mxu0  ;;  %1442 = vrot.lane.b32.xlu1 %v3191_v20, %s2829_s21 }
 0x193   : > { %v629_v46 = vadd.f32 %v628_v45, %v3101_v18  ;;  %v630_v47 = vpop.f32.mrb[26].mxu0  ;;  %985 = vmatprep.mubr.bf16.mxu1 %v688_v42 }
 0x194   : > { %v631_v48 = vadd.f32 %v630_v47, %v3099_v17  ;;  %v632_v49 = vpop.f32.mrb[27].mxu0  ;;  %986 = vmatmul.mubr.bf16.gmra.mrb[20].mxu1 %v687_v41  ;;  %v669_v51 = vmax.f32 %v627_v44, 0.0 }
 0x195   : > { %v633_v50 = vadd.f32 %v632_v49, %v3101_v18  ;;  %v670_v53 = vmax.f32 %v629_v46, 0.0 }
 0x196   : > { %v671_v52 = vmax.f32 %v631_v48, 0.0  ;;  %1446 = vrot.lane.b32.xlu1 %v3201_v22, %s2829_s21 }
 0x197   : > { %v672_v54 = vmax.f32 %v633_v50, 0.0 }
 0x198   : > { %v689_v55 = vpack.c.bf16 %v671_v52, %v669_v51 }
 0x199   : > { %v690_v56 = vpack.c.bf16 %v672_v54, %v670_v53  ;;  %v636_v57 = vpop.f32.mrb[28].mxu0 }
 0x19a   : > { %v637_v2 = vadd.f32 %v636_v57, %v3099_v17  ;;  %v638_v58 = vpop.f32.mrb[29].mxu0  ;;  %1450 = vrot.lane.b32.xlu1 %v3211_v24, %s2829_s21 }
 0x19b   : > { %v639_v59 = vadd.f32 %v638_v58, %v3101_v18  ;;  %v640_v60 = vpop.f32.mrb[30].mxu0  ;;  %995 = vmatprep.mubr.bf16.mxu1 %v690_v56 }
 0x19c   : > { %v641_v61 = vadd.f32 %v640_v60, %v3099_v17  ;;  %v642_v62 = vpop.f32.mrb[31].mxu0  ;;  %996 = vmatmul.mubr.bf16.gmra.mrb[24].mxu1 %v689_v55  ;;  %v673_v0 = vmax.f32 %v637_v2, 0.0  ;;  %v2658_v17 = vld [vmem:[%s4154_s6 + $0x38] sm:$0xff]  }
 0x19d   : > { %v643_v63 = vadd.f32 %v642_v62, %v3101_v18  ;;  %v674_v3 = vmax.f32 %v639_v59, 0.0  ;;  %2491 = vmatpush3.bf16.msra.mxu0 %v2658_v17  ;;  %v3148_v18 = vld [vmem:[%s3145_s20] sm:$0xff] }
 0x19e   : > { %v675_v1 = vmax.f32 %v641_v61, 0.0  ;;  %1424 = vrot.lane.b32.xlu0 %v3148_v18, %s2829_s21  ;;  %1454 = vrot.lane.b32.xlu1 %v3221_v26, %s2829_s21 }
 0x19f   : > { %v676_v4 = vmax.f32 %v643_v63, 0.0 }
 0x1a0   : > { %v691_v5 = vpack.c.bf16 %v675_v1, %v673_v0 }
 0x1a1   : > { %v692_v6 = vpack.c.bf16 %v676_v4, %v674_v3 }
 0x1a2   : > { %1428 = vrot.lane.b32.xlu0 %v3158_v9, %s2829_s21 }
 0x1a3   : > { %1005 = vmatprep.mubr.bf16.mxu1 %v692_v6 }
 0x1a4   : > { %1006 = vmatmul.mubr.bf16.gmra.mrb[28].mxu1 %v691_v5 }
 0x1a6   : > { %1432 = vrot.lane.b32.xlu0 %v3168_v12, %s2829_s21 }
 0x1aa   : > { %1436 = vrot.lane.b32.xlu0 %v3178_v15, %s2829_s21 }
 0x1ae   : > { %1440 = vrot.lane.b32.xlu0 %v3188_v19, %s2829_s21 }
 0x1b2   : > { %1444 = vrot.lane.b32.xlu0 %v3198_v21, %s2829_s21 }
 0x1b6   : > { %1448 = vrot.lane.b32.xlu0 %v3208_v23, %s2829_s21 }
 0x1ba   : > { %1452 = vrot.lane.b32.xlu0 %v3218_v25, %s2829_s21 }
 0x23f   : > { %v937_v33 = vpop.f32.mrb[0].mxu1 }
 0x240   : > { %v938_v34 = vadd.f32 %v937_v33, %v3231_v31  ;;  %v939_v35 = vpop.f32.mrb[1].mxu1 }
 0x241   : > { %v940_v36 = vadd.f32 %v939_v35, %v3233_v32  ;;  %v941_v37 = vpop.f32.mrb[2].mxu1 }
 0x242   : > { %v942_v38 = vadd.f32 %v941_v37, %v3231_v31  ;;  %v943_v39 = vpop.f32.mrb[3].mxu1  ;;  %v1016_v40 = vmax.f32 %v938_v34, 0.0 }
 0x243   : > { %v944_v11 = vadd.f32 %v943_v39, %v3233_v32  ;;  %v1017_v42 = vmax.f32 %v940_v36, 0.0 }
 0x244   : > { %v1018_v41 = vmax.f32 %v942_v38, 0.0 }
 0x245   : > { %v1019_v13 = vmax.f32 %v944_v11, 0.0 }
 0x246   : > { %v1048_v43 = vpack.c.bf16 %v1018_v41, %v1016_v40 }
 0x247   : > { %v1049_v44 = vpack.c.bf16 %v1019_v13, %v1017_v42  ;;  %v947_v45 = vpop.f32.mrb[4].mxu1 }
 0x248   : > { %v948_v46 = vadd.f32 %v947_v45, %v3231_v31  ;;  %v949_v47 = vpop.f32.mrb[5].mxu1 }
 0x249   : > { %v950_v48 = vadd.f32 %v949_v47, %v3233_v32  ;;  %v951_v49 = vpop.f32.mrb[6].mxu1  ;;  %1231 = vmatprep.mubr.bf16.mxu0 %v1049_v44 }
 0x24a   : > { %v952_v50 = vadd.f32 %v951_v49, %v3231_v31  ;;  %v953_v51 = vpop.f32.mrb[7].mxu1  ;;  %1232 = vmatmul.mubr.bf16.vlgmr.msra.gmra.mrb[32].mxu0 %v1048_v43  ;;  %v1020_v53 = vmax.f32 %v948_v46, 0.0 }
 0x24b   : > { %v954_v52 = vadd.f32 %v953_v51, %v3233_v32  ;;  %v1021_v55 = vmax.f32 %v950_v48, 0.0 }
 0x24c   : > { %v1022_v54 = vmax.f32 %v952_v50, 0.0 }
 0x24d   : > { %v1023_v56 = vmax.f32 %v954_v52, 0.0 }
 0x24e   : > { %v1050_v57 = vpack.c.bf16 %v1022_v54, %v1020_v53 }
 0x24f   : > { %v1051_v2 = vpack.c.bf16 %v1023_v56, %v1021_v55  ;;  %v957_v58 = vpop.f32.mrb[8].mxu1 }
 0x250   : > { %v958_v59 = vadd.f32 %v957_v58, %v3231_v31  ;;  %v959_v60 = vpop.f32.mrb[9].mxu1 }
 0x251   : > { %v960_v61 = vadd.f32 %v959_v60, %v3233_v32  ;;  %v961_v62 = vpop.f32.mrb[10].mxu1  ;;  %1239 = vmatprep.mubr.bf16.mxu0 %v1051_v2 }
 0x252   : > { %v962_v63 = vadd.f32 %v961_v62, %v3231_v31  ;;  %v963_v0 = vpop.f32.mrb[11].mxu1  ;;  %1240 = vmatmul.mubr.bf16.gmra.mrb[36].mxu0 %v1050_v57  ;;  %v1024_v3 = vmax.f32 %v958_v59, 0.0 }
 0x253   : > { %v964_v1 = vadd.f32 %v963_v0, %v3233_v32  ;;  %v1025_v5 = vmax.f32 %v960_v61, 0.0 }
 0x254   : > { %v1026_v4 = vmax.f32 %v962_v63, 0.0 }
 0x255   : > { %v1027_v6 = vmax.f32 %v964_v1, 0.0 }
 0x256   : > { %v1052_v7 = vpack.c.bf16 %v1026_v4, %v1024_v3 }
 0x257   : > { %v1053_v17 = vpack.c.bf16 %v1027_v6, %v1025_v5  ;;  %v967_v27 = vpop.f32.mrb[12].mxu1 }
 0x258   : > { %v968_v28 = vadd.f32 %v967_v27, %v3231_v31  ;;  %v969_v29 = vpop.f32.mrb[13].mxu1 }
 0x259   : > { %v970_v30 = vadd.f32 %v969_v29, %v3233_v32  ;;  %v971_v33 = vpop.f32.mrb[14].mxu1  ;;  %1247 = vmatprep.mubr.bf16.mxu0 %v1053_v17 }
 0x25a   : > { %v972_v34 = vadd.f32 %v971_v33, %v3231_v31  ;;  %v973_v35 = vpop.f32.mrb[15].mxu1  ;;  %1248 = vmatmul.mubr.bf16.gmra.mrb[40].mxu0 %v1052_v7  ;;  %v1028_v37 = vmax.f32 %v968_v28, 0.0 }
 0x25b   : > { %v974_v36 = vadd.f32 %v973_v35, %v3233_v32  ;;  %v1029_v39 = vmax.f32 %v970_v30, 0.0 }
 0x25c   : > { %v1030_v38 = vmax.f32 %v972_v34, 0.0 }
 0x25d   : > { %v1031_v11 = vmax.f32 %v974_v36, 0.0 }
 0x25e   : > { %v1054_v40 = vpack.c.bf16 %v1030_v38, %v1028_v37 }
 0x25f   : > { %v1055_v41 = vpack.c.bf16 %v1031_v11, %v1029_v39  ;;  %v977_v42 = vpop.f32.mrb[16].mxu1 }
 0x260   : > { %v978_v13 = vadd.f32 %v977_v42, %v3231_v31  ;;  %v979_v43 = vpop.f32.mrb[17].mxu1 }
 0x261   : > { %v980_v44 = vadd.f32 %v979_v43, %v3233_v32  ;;  %v981_v45 = vpop.f32.mrb[18].mxu1  ;;  %1255 = vmatprep.mubr.bf16.mxu0 %v1055_v41 }
 0x262   : > { %v982_v46 = vadd.f32 %v981_v45, %v3231_v31  ;;  %v983_v47 = vpop.f32.mrb[19].mxu1  ;;  %1256 = vmatmul.mubr.bf16.gmra.mrb[44].mxu0 %v1054_v40  ;;  %v1032_v49 = vmax.f32 %v978_v13, 0.0 }
 0x263   : > { %v984_v48 = vadd.f32 %v983_v47, %v3233_v32  ;;  %v1033_v51 = vmax.f32 %v980_v44, 0.0 }
 0x264   : > { %v1034_v50 = vmax.f32 %v982_v46, 0.0 }
 0x265   : > { %v1035_v52 = vmax.f32 %v984_v48, 0.0 }
 0x266   : > { %v1056_v53 = vpack.c.bf16 %v1034_v50, %v1032_v49 }
 0x267   : > { %v1057_v54 = vpack.c.bf16 %v1035_v52, %v1033_v51  ;;  %v987_v55 = vpop.f32.mrb[20].mxu1  ;;  %v3270_v52 = vld [vmem:[%s4155_s7] ss:$0 sm:$0xff] }
 0x268   : > { %v988_v56 = vadd.f32 %v987_v55, %v3231_v31  ;;  %v989_v57 = vpop.f32.mrb[21].mxu1 }
 0x269   : > { %v990_v2 = vadd.f32 %v989_v57, %v3233_v32  ;;  %v991_v58 = vpop.f32.mrb[22].mxu1  ;;  %1263 = vmatprep.mubr.bf16.mxu0 %v1057_v54 }
 0x26a   : > { %v992_v59 = vadd.f32 %v991_v58, %v3231_v31  ;;  %v993_v60 = vpop.f32.mrb[23].mxu1  ;;  %1264 = vmatmul.mubr.bf16.gmra.mrb[48].mxu0 %v1056_v53  ;;  %v1036_v62 = vmax.f32 %v988_v56, 0.0 }
 0x26b   : > { %v994_v61 = vadd.f32 %v993_v60, %v3233_v32  ;;  %v1037_v0 = vmax.f32 %v990_v2, 0.0 }
 0x26c   : > { %v1038_v63 = vmax.f32 %v992_v59, 0.0 }
 0x26d   : > { %v1039_v1 = vmax.f32 %v994_v61, 0.0 }
 0x26e   : > { %v1058_v3 = vpack.c.bf16 %v1038_v63, %v1036_v62 }
 0x26f   : > { %v1059_v4 = vpack.c.bf16 %v1039_v1, %v1037_v0  ;;  %v997_v5 = vpop.f32.mrb[24].mxu1 }
 0x270   : > { %v998_v6 = vadd.f32 %v997_v5, %v3231_v31  ;;  %v999_v7 = vpop.f32.mrb[25].mxu1 }
 0x271   : > { %v1000_v17 = vadd.f32 %v999_v7, %v3233_v32  ;;  %v1001_v27 = vpop.f32.mrb[26].mxu1  ;;  %1271 = vmatprep.mubr.bf16.mxu0 %v1059_v4 }
 0x272   : > { %v1002_v28 = vadd.f32 %v1001_v27, %v3231_v31  ;;  %v1003_v29 = vpop.f32.mrb[27].mxu1  ;;  %1272 = vmatmul.mubr.bf16.gmra.mrb[52].mxu0 %v1058_v3  ;;  %v1040_v33 = vmax.f32 %v998_v6, 0.0 }
 0x273   : > { %v1004_v30 = vadd.f32 %v1003_v29, %v3233_v32  ;;  %v1041_v35 = vmax.f32 %v1000_v17, 0.0 }
 0x274   : > { %v1042_v34 = vmax.f32 %v1002_v28, 0.0 }
 0x275   : > { %v1043_v36 = vmax.f32 %v1004_v30, 0.0 }
 0x276   : > { %v1060_v37 = vpack.c.bf16 %v1042_v34, %v1040_v33 }
 0x277   : > { %v1061_v38 = vpack.c.bf16 %v1043_v36, %v1041_v35  ;;  %v1007_v39 = vpop.f32.mrb[28].mxu1 }
 0x278   : > { %v1008_v11 = vadd.f32 %v1007_v39, %v3231_v31  ;;  %v1009_v40 = vpop.f32.mrb[29].mxu1 }
 0x279   : > { %v1010_v41 = vadd.f32 %v1009_v40, %v3233_v32  ;;  %v1011_v42 = vpop.f32.mrb[30].mxu1  ;;  %1279 = vmatprep.mubr.bf16.mxu0 %v1061_v38  ;;  %v1425_v40 = vpop.permute.xlu0 %1424 }
 0x27a   : > { %v1012_v13 = vadd.f32 %v1011_v42, %v3231_v31  ;;  %v1013_v43 = vpop.f32.mrb[31].mxu1  ;;  %1280 = vmatmul.mubr.bf16.gmra.mrb[56].mxu0 %v1060_v37  ;;  %v1044_v45 = vmax.f32 %v1008_v11, 0.0 }
 0x27b   : > { %v1014_v44 = vadd.f32 %v1013_v43, %v3233_v32  ;;  %v1045_v47 = vmax.f32 %v1010_v41, 0.0 }
 0x27c   : > { %v1046_v46 = vmax.f32 %v1012_v13, 0.0  ;;  %v1427_v13 = vpop.permute.xlu1 %1426 }
 0x27d   : > { %v1047_v48 = vmax.f32 %v1014_v44, 0.0 }
 0x27e   : > { %v1062_v49 = vpack.c.bf16 %v1046_v46, %v1044_v45 }
 0x27f   : > { %v1063_v50 = vpack.c.bf16 %v1047_v48, %v1045_v47 }
 0x281   : > { %1287 = vmatprep.mubr.bf16.mxu0 %v1063_v50 }
 0x282   : > { %1288 = vmatmul.mubr.bf16.gmra.mrb[60].mxu0 %v1062_v49 }
 0x31d   : > { %v2492_v51 = vpop.f32.mrb[32].mxu0 }
 0x31e   : > { %v2493_v53 = vpop.f32.mrb[33].mxu0 }
 0x31f   : > { %v2494_v31 = vadd.f32 %v2493_v53, %v2492_v51  ;;  %v2495_v54 = vpop.f32.mrb[34].mxu0 }
 0x320   : > { %v2496_v55 = vpop.f32.mrb[35].mxu0 }
 0x321   : > { %v3273_v32 = vadd.f32 %v2494_v31, %v3270_v52  ;;  %v2497_v56 = vadd.f32 %v2496_v55, %v2495_v54 }
 0x323   : > { %v3276_v57 = vadd.f32 %v2497_v56, %v3270_v52  ;;  %v1328_v2 = vmax.f32 %v3273_v32, -5.0 }
 0x325   : > { %v2498_v58 = vpop.f32.mrb[36].mxu0  ;;  %v1344_v59 = vmin.f32 %v1328_v2, 2.0  ;;  %v1329_v60 = vmax.f32 %v3276_v57, -5.0 }
 0x326   : > { %v2499_v61 = vpop.f32.mrb[37].mxu0 }
 0x327   : > { %v2500_v62 = vadd.f32 %v2499_v61, %v2498_v58  ;;  %v2501_v63 = vpop.f32.mrb[38].mxu0  ;;  %1648 = vrot.lane.b32.xlu0 %v1344_v59, %s2830_s24  ;;  %v1360_v0 = vmul.f32 1.442695, %v1344_v59  ;;  %v1345_v1 = vmin.f32 %v1329_v60, 2.0  ;;  %v1429_v58 = vpop.permute.xlu0 %1428 }
 0x328   : > { %v2502_v3 = vpop.f32.mrb[39].mxu0 }
 0x329   : > { %v3282_v4 = vadd.f32 %v2500_v62, %v3270_v52  ;;  %2659 = vpow2.f32 %v1360_v0  ;;  %v2503_v5 = vadd.f32 %v2502_v3, %v2501_v63  ;;  %1650 = vrot.lane.b32.xlu1 %v1345_v1, %s2830_s24  ;;  %v1362_v6 = vmul.f32 1.442695, %v1345_v1  ;;  %v1431_v62 = vpop.permute.xlu1 %1430 }
 0x32b   : > { %v3286_v7 = vadd.f32 %v2503_v5, %v3270_v52  ;;  %2661 = vpow2.f32 %v1362_v6  ;;  %v1330_v17 = vmax.f32 %v3282_v4, -5.0 }
 0x32d   : > { %v2504_v27 = vpop.f32.mrb[40].mxu0  ;;  %v1346_v28 = vmin.f32 %v1330_v17, 2.0  ;;  %v1331_v29 = vmax.f32 %v3286_v7, -5.0 }
 0x32e   : > { %v2505_v30 = vpop.f32.mrb[41].mxu0 }
 0x32f   : > { %v2506_v33 = vadd.f32 %v2505_v30, %v2504_v27  ;;  %v2507_v34 = vpop.f32.mrb[42].mxu0  ;;  %v1364_v35 = vmul.f32 1.442695, %v1346_v28  ;;  %1652 = vrot.lane.b32.xlu0 %v1346_v28, %s2830_s24  ;;  %v1347_v36 = vmin.f32 %v1331_v29, 2.0 }
 0x330   : > { %v2508_v37 = vpop.f32.mrb[43].mxu0 }
 0x331   : > { %v3292_v38 = vadd.f32 %v2506_v33, %v3270_v52  ;;  %2663 = vpow2.f32 %v1364_v35  ;;  %v2509_v39 = vadd.f32 %v2508_v37, %v2507_v34  ;;  %v1366_v11 = vmul.f32 1.442695, %v1347_v36  ;;  %1654 = vrot.lane.b32.xlu1 %v1347_v36, %s2830_s24  ;;  %v1433_v37 = vpop.permute.xlu0 %1432 }
 0x333   : > { %v2660_v41 = vpop.eup %2659  ;;  %v3296_v42 = vadd.f32 %v2509_v39, %v3270_v52  ;;  %2665 = vpow2.f32 %v1366_v11  ;;  %v1332_v43 = vmax.f32 %v3292_v38, -5.0 }
 0x334   : > { %v1472_v44 = vmul.f32 %v2660_v41, %v1425_v40  ;;  %v1435_v41 = vpop.permute.xlu1 %1434 }
 0x335   : > { %v2662_v45 = vpop.eup %2661  ;;  %v2510_v46 = vpop.f32.mrb[44].mxu0  ;;  %v1348_v47 = vmin.f32 %v1332_v43, 2.0  ;;  %v1333_v48 = vmax.f32 %v3296_v42, -5.0 }
 0x336   : > { %v1473_v49 = vmul.f32 %v2662_v45, %v1427_v13  ;;  %v2511_v50 = vpop.f32.mrb[45].mxu0  ;;  %1504 = vrot.lane.b32.xlu0 %v1472_v44, %s2830_s24 }
 0x337   : > { %v2512_v51 = vadd.f32 %v2511_v50, %v2510_v46  ;;  %v2513_v53 = vpop.f32.mrb[46].mxu0  ;;  %v1368_v31 = vmul.f32 1.442695, %v1348_v47  ;;  %v1349_v54 = vmin.f32 %v1333_v48, 2.0 }
 0x338   : > { %v2514_v55 = vpop.f32.mrb[47].mxu0  ;;  %1506 = vrot.lane.b32.xlu1 %v1473_v49, %s2830_s24 }
 0x339   : > { %v3303_v56 = vadd.f32 %v2512_v51, %v3270_v52  ;;  %v2515_v2 = vadd.f32 %v2514_v55, %v2513_v53  ;;  %2667 = vpow2.f32 %v1368_v31  ;;  %v1370_v59 = vmul.f32 1.442695, %v1349_v54 }
 0x33a   : > { %1656 = vrot.lane.b32.xlu0 %v1348_v47, %s2830_s24 }
 0x33b   : > { %v2664_v60 = vpop.eup %2663  ;;  %v3307_v61 = vadd.f32 %v2515_v2, %v3270_v52  ;;  %2669 = vpow2.f32 %v1370_v59  ;;  %v1334_v63 = vmax.f32 %v3303_v56, -5.0 }
 0x33c   : > { %v1474_v0 = vmul.f32 %v2664_v60, %v1429_v58  ;;  %1658 = vrot.lane.b32.xlu1 %v1349_v54, %s2830_s24  ;;  %v1437_v58 = vpop.permute.xlu0 %1436 }
 0x33d   : > { %v2666_v1 = vpop.eup %2665  ;;  %v2516_v3 = vpop.f32.mrb[48].mxu0  ;;  %v1350_v5 = vmin.f32 %v1334_v63, 2.0  ;;  %v1335_v6 = vmax.f32 %v3307_v61, -5.0 }
 0x33e   : > { %v1475_v17 = vmul.f32 %v2666_v1, %v1431_v62  ;;  %v2517_v27 = vpop.f32.mrb[49].mxu0  ;;  %1508 = vrot.lane.b32.xlu0 %v1474_v0, %s2830_s24  ;;  %v1439_v0 = vpop.permute.xlu1 %1438 }
 0x33f   : > { %v2518_v28 = vadd.f32 %v2517_v27, %v2516_v3  ;;  %v2519_v29 = vpop.f32.mrb[50].mxu0  ;;  %v1372_v30 = vmul.f32 1.442695, %v1350_v5  ;;  %v1351_v33 = vmin.f32 %v1335_v6, 2.0 }
 0x340   : > { %v2520_v34 = vpop.f32.mrb[51].mxu0  ;;  %1510 = vrot.lane.b32.xlu1 %v1475_v17, %s2830_s24 }
 0x341   : > { %v3315_v35 = vadd.f32 %v2518_v28, %v3270_v52  ;;  %v2521_v36 = vadd.f32 %v2520_v34, %v2519_v29  ;;  %2671 = vpow2.f32 %v1372_v30  ;;  %v1374_v39 = vmul.f32 1.442695, %v1351_v33 }
 0x342   : > { %1660 = vrot.lane.b32.xlu0 %v1350_v5, %s2830_s24 }
 0x343   : > { %v2668_v11 = vpop.eup %2667  ;;  %v3319_v40 = vadd.f32 %v2521_v36, %v3270_v52  ;;  %2673 = vpow2.f32 %v1374_v39  ;;  %v1336_v13 = vmax.f32 %v3315_v35, -5.0 }
 0x344   : > { %v1476_v43 = vmul.f32 %v2668_v11, %v1433_v37  ;;  %1662 = vrot.lane.b32.xlu1 %v1351_v33, %s2830_s24 }
 0x345   : > { %4197 = vst [vmem:[#allocation2_spill] sm:$0xff] %v3319_v40  ;;  %v2670_v44 = vpop.eup %2669  ;;  %v2522_v45 = vpop.f32.mrb[52].mxu0  ;;  %v1352_v46 = vmin.f32 %v1336_v13, 2.0  ;;  %v1337_v47 = vmax.f32 %v3319_v40, -5.0 }
 0x346   : > { %v1477_v48 = vmul.f32 %v2670_v44, %v1435_v41  ;;  %v2523_v49 = vpop.f32.mrb[53].mxu0  ;;  %1512 = vrot.lane.b32.xlu0 %v1476_v43, %s2830_s24  ;;  %v1441_v41 = vpop.permute.xlu0 %1440 }
 0x347   : > { %v2524_v50 = vadd.f32 %v2523_v49, %v2522_v45  ;;  %v2525_v51 = vpop.f32.mrb[54].mxu0  ;;  %v1376_v53 = vmul.f32 1.442695, %v1352_v46  ;;  %v1353_v31 = vmin.f32 %v1337_v47, 2.0  ;;  %v1443_v45 = vpop.permute.xlu1 %1442 }
 0x348   : > { %v2526_v54 = vpop.f32.mrb[55].mxu0  ;;  %1514 = vrot.lane.b32.xlu1 %v1477_v48, %s2830_s24 }
 0x349   : > { %v3327_v55 = vadd.f32 %v2524_v50, %v3270_v52  ;;  %v2527_v2 = vadd.f32 %v2526_v54, %v2525_v51  ;;  %2675 = vpow2.f32 %v1376_v53  ;;  %v1378_v59 = vmul.f32 1.442695, %v1353_v31 }
 0x34a   : > { %1664 = vrot.lane.b32.xlu0 %v1352_v46, %s2830_s24 }
 0x34b   : > { %4198 = vst [vmem:[#allocation3_spill] sm:$0xff] %v3327_v55  ;;  %v2672_v60 = vpop.eup %2671  ;;  %v1338_v62 = vmax.f32 %v3327_v55, -5.0  ;;  %v3332_v63 = vadd.f32 %v2527_v2, %v3270_v52  ;;  %2677 = vpow2.f32 %v1378_v59 }
 0x34c   : > { %v1478_v1 = vmul.f32 %v2672_v60, %v1437_v58  ;;  %1666 = vrot.lane.b32.xlu1 %v1353_v31, %s2830_s24 }
 0x34d   : > { %4199 = vst [vmem:[#allocation4_spill] sm:$0xff] %v3332_v63  ;;  %v2674_v3 = vpop.eup %2673  ;;  %v3335_v5 = vmin.f32 %v1338_v62, 2.0  ;;  %v1339_v6 = vmax.f32 %v3332_v63, -5.0  ;;  %v2528_v17 = vpop.f32.mrb[56].mxu0 }
 0x34e   : > { %v1479_v27 = vmul.f32 %v2674_v3, %v1439_v0  ;;  %v2529_v28 = vpop.f32.mrb[57].mxu0  ;;  %1516 = vrot.lane.b32.xlu0 %v1478_v1, %s2830_s24  ;;  %v1445_v1 = vpop.permute.xlu0 %1444 }
 0x34f   : > { %v1380_v29 = vmul.f32 1.442695, %v3335_v5  ;;  %v3340_v30 = vmin.f32 %v1339_v6, 2.0  ;;  %v2530_v33 = vadd.f32 %v2529_v28, %v2528_v17  ;;  %v2531_v34 = vpop.f32.mrb[58].mxu0 }
 0x350   : > { %v2532_v36 = vpop.f32.mrb[59].mxu0  ;;  %1518 = vrot.lane.b32.xlu1 %v1479_v27, %s2830_s24  ;;  %v1447_v27 = vpop.permute.xlu1 %1446 }
 0x351   : > { %2679 = vpow2.f32 %v1380_v29  ;;  %v1382_v37 = vmul.f32 1.442695, %v3340_v30  ;;  %v3345_v39 = vadd.f32 %v2530_v33, %v3270_v52  ;;  %v2533_v11 = vadd.f32 %v2532_v36, %v2531_v34 }
 0x353   : > { %4200 = vst [vmem:[#allocation5_spill] sm:$0xff] %v3345_v39  ;;  %v2676_v13 = vpop.eup %2675  ;;  %2681 = vpow2.f32 %v1382_v37  ;;  %v1340_v43 = vmax.f32 %v3345_v39, -5.0  ;;  %v3349_v44 = vadd.f32 %v2533_v11, %v3270_v52 }
 0x354   : > { %v1480_v46 = vmul.f32 %v2676_v13, %v1441_v41  ;;  %v1449_v13 = vpop.permute.xlu0 %1448 }
 0x355   : > { %4201 = vst [vmem:[#allocation6_spill] sm:$0xff] %v3349_v44  ;;  %v2678_v47 = vpop.eup %2677  ;;  %v1356_v48 = vmin.f32 %v1340_v43, 2.0  ;;  %v1341_v49 = vmax.f32 %v3349_v44, -5.0  ;;  %v2534_v50 = vpop.f32.mrb[60].mxu0 }
 0x356   : > { %v1481_v51 = vmul.f32 %v2678_v47, %v1443_v45  ;;  %v2535_v53 = vpop.f32.mrb[61].mxu0  ;;  %1520 = vrot.lane.b32.xlu0 %v1480_v46, %s2830_s24 }
 0x357   : > { %v1384_v31 = vmul.f32 1.442695, %v1356_v48  ;;  %v1357_v54 = vmin.f32 %v1341_v49, 2.0  ;;  %v2536_v2 = vadd.f32 %v2535_v53, %v2534_v50  ;;  %v2537_v58 = vpop.f32.mrb[62].mxu0 }
 0x358   : > { %v2538_v59 = vpop.f32.mrb[63].mxu0  ;;  %1522 = vrot.lane.b32.xlu1 %v1481_v51, %s2830_s24  ;;  %v1453_v49 = vpop.permute.xlu0 %1452 }
 0x359   : > { %2683 = vpow2.f32 %v1384_v31  ;;  %v1386_v60 = vmul.f32 1.442695, %v1357_v54  ;;  %v3355_v62 = vadd.f32 %v2536_v2, %v3270_v52  ;;  %v2539_v0 = vadd.f32 %v2538_v59, %v2537_v58 }
 0x35a   : > { %v2443_v58 = vclamps-f32 %v3276_v57, 9.0  ;;  %v2442_v59 = vclamps-f32 %v3273_v32, 9.0 }
 0x35b   : > { %4202 = vst [vmem:[#allocation7_spill] sm:$0xff] %v3355_v62  ;;  %v2680_v3 = vpop.eup %2679  ;;  %2685 = vpow2.f32 %v1386_v60  ;;  %v1342_v6 = vmax.f32 %v3355_v62, -5.0  ;;  %v3359_v17 = vadd.f32 %v2539_v0, %v3270_v52  ;;  %v1451_v52 = vpop.permute.xlu1 %1450  ;;  %v2446_v60 = vclamps-f32 %v3292_v38, 9.0 }
 0x35c   : > { %v1482_v28 = vmul.f32 %v2680_v3, %v1445_v1  ;;  %v2444_v0 = vclamps-f32 %v3282_v4, 9.0  ;;  %v2445_v1 = vclamps-f32 %v3286_v7, 9.0  ;;  %v1601_v7 = vmul.f32 -0.5, %v3151_v8 }
 0x35d   : > { %4203 = vst [vmem:[#allocation8_spill] sm:$0xff] %v3359_v17  ;;  %v2682_v29 = vpop.eup %2681  ;;  %v1358_v33 = vmin.f32 %v1342_v6, 2.0  ;;  %v1343_v34 = vmax.f32 %v3359_v17, -5.0  ;;  %v4160_v6 = vclamps-f32 %v3327_v55, 9.0 }
 0x35e   : > { %v1483_v36 = vmul.f32 %v2682_v29, %v1447_v27  ;;  %1524 = vrot.lane.b32.xlu0 %v1482_v28, %s2830_s24  ;;  %v4163_v28 = vclamps-f32 %v3307_v61, 9.0 }
 0x35f   : > { %v1388_v37 = vmul.f32 1.442695, %v1358_v33  ;;  %v1359_v11 = vmin.f32 %v1343_v34, 2.0  ;;  %v1455_v51 = vpop.permute.xlu1 %1454 }
 0x360   : > { %1526 = vrot.lane.b32.xlu1 %v1483_v36, %s2830_s24  ;;  %v4161_v36 = vclamps-f32 %v3319_v40, 9.0 }
 0x361   : > { %2687 = vpow2.f32 %v1388_v37  ;;  %v1390_v41 = vmul.f32 1.442695, %v1359_v11 }
 0x363   : > { %v2684_v43 = vpop.eup %2683  ;;  %2689 = vpow2.f32 %v1390_v41  ;;  %v4159_v41 = vclamps-f32 %v3332_v63, 9.0  ;;  %v1614_v63 = vmul.f32 -0.5, %v3218_v25 }
 0x364   : > { %v1484_v45 = vmul.f32 %v2684_v43, %v1449_v13  ;;  %2691 = vtanh.f32 %v2443_v58 }
 0x365   : > { %v2686_v46 = vpop.eup %2685  ;;  %2693 = vtanh.f32 %v2442_v59 }
 0x366   : > { %v1485_v47 = vmul.f32 %v2686_v46, %v1451_v52  ;;  %1528 = vrot.lane.b32.xlu0 %v1484_v45, %s2830_s24  ;;  %2695 = vtanh.f32 %v2446_v60  ;;  %v4157_v52 = vclamps-f32 %v3349_v44, 9.0 }
 0x367   : > { %2697 = vtanh.f32 %v2444_v0 }
 0x368   : > { %1530 = vrot.lane.b32.xlu1 %v1485_v47, %s2830_s24 }
 0x36b   : > { %v2688_v50 = vpop.eup %2687 }
 0x36c   : > { %v1486_v53 = vmul.f32 %v2688_v50, %v1453_v49 }
 0x36d   : > { %v2690_v31 = vpop.eup %2689 }
 0x36e   : > { %v1487_v2 = vmul.f32 %v2690_v31, %v1455_v51  ;;  %1532 = vrot.lane.b32.xlu0 %v1486_v53, %s2830_s24 }
 0x370   : > { %1534 = vrot.lane.b32.xlu1 %v1487_v2, %s2830_s24 }
 0x372   : > { %1668 = vrot.lane.b32.xlu0 %v3335_v5, %s2830_s24  ;;  %v4164_v5 = vclamps-f32 %v3303_v56, 9.0 }
 0x374   : > { %1670 = vrot.lane.b32.xlu1 %v3340_v30, %s2830_s24  ;;  %2699 = vtanh.f32 %v4164_v5  ;;  %v4162_v30 = vclamps-f32 %v3315_v35, 9.0  ;;  %v1609_v5 = vmul.f32 -0.5, %v3191_v20 }
 0x375   : > { %2701 = vtanh.f32 %v2445_v1 }
 0x376   : > { %1672 = vrot.lane.b32.xlu0 %v1356_v48, %s2830_s24  ;;  %v2692_v48 = vpop.eup %2691  ;;  %2703 = vtanh.f32 %v4162_v30  ;;  %v1608_v30 = vmul.f32 -0.5, %v3188_v19 }
 0x377   : > { %v2694_v3 = vpop.eup %2693 }
 0x378   : > { %1674 = vrot.lane.b32.xlu1 %v1357_v54, %s2830_s24  ;;  %v4165_v54 = vclamps-f32 %v3296_v42, 9.0  ;;  %v2696_v27 = vpop.eup %2695 }
 0x379   : > { %v2698_v29 = vpop.eup %2697 }
 0x37a   : > { %1676 = vrot.lane.b32.xlu0 %v1358_v33, %s2830_s24  ;;  %2705 = vtanh.f32 %v4165_v54  ;;  %v4158_v33 = vclamps-f32 %v3345_v39, 9.0  ;;  %v1611_v54 = vmul.f32 -0.5, %v3201_v22  ;;  %v1613_v39 = vmul.f32 -0.5, %v3211_v24 }
 0x37b   : > { %2707 = vtanh.f32 %v4160_v6 }
 0x37c   : > { %1678 = vrot.lane.b32.xlu1 %v1359_v11, %s2830_s24  ;;  %2709 = vtanh.f32 %v4163_v28 }
 0x37d   : > { %2711 = vtanh.f32 %v4158_v33  ;;  %v1603_v33 = vmul.f32 -0.5, %v3161_v10 }
 0x37e   : > { %2179 = vrot.lane.b32.xlu0 %v2692_v48, %s2829_s21  ;;  %v2700_v34 = vpop.eup %2699  ;;  %2713 = vtanh.f32 %v4161_v36  ;;  %v1606_v36 = vmul.f32 -0.5, %v3178_v15 }
 0x37f   : > { %v2702_v37 = vpop.eup %2701  ;;  %2715 = vtanh.f32 %v4159_v41  ;;  %v1605_v41 = vmul.f32 -0.5, %v3171_v14 }
 0x380   : > { %2177 = vrot.lane.b32.xlu1 %v2694_v3, %s2829_s21  ;;  %v2704_v11 = vpop.eup %2703  ;;  %2717 = vtanh.f32 %v4157_v52 }
 0x382   : > { %2185 = vrot.lane.b32.xlu0 %v2696_v27, %s2829_s21 }
 0x384   : > { %2181 = vrot.lane.b32.xlu1 %v2698_v29, %s2829_s21  ;;  %v2706_v13 = vpop.eup %2705 }
 0x385   : > { %v2708_v43 = vpop.eup %2707 }
 0x386   : > { %2189 = vrot.lane.b32.xlu0 %v2700_v34, %s2829_s21  ;;  %v2710_v45 = vpop.eup %2709 }
 0x387   : > { %v2712_v46 = vpop.eup %2711 }
 0x388   : > { %2183 = vrot.lane.b32.xlu1 %v2702_v37, %s2829_s21  ;;  %v2714_v47 = vpop.eup %2713 }
 0x389   : > { %v2716_v49 = vpop.eup %2715 }
 0x38a   : > { %2193 = vrot.lane.b32.xlu0 %v2704_v11, %s2829_s21  ;;  %v2718_v50 = vpop.eup %2717 }
 0x38c   : > { %2187 = vrot.lane.b32.xlu1 %v2706_v13, %s2829_s21 }
 0x38e   : > { %2197 = vrot.lane.b32.xlu0 %v2708_v43, %s2829_s21 }
 0x390   : > { %2191 = vrot.lane.b32.xlu1 %v2710_v45, %s2829_s21 }
 0x392   : > { %2201 = vrot.lane.b32.xlu0 %v2712_v46, %s2829_s21 }
 0x394   : > { %2195 = vrot.lane.b32.xlu1 %v2714_v47, %s2829_s21 }
 0x398   : > { %2199 = vrot.lane.b32.xlu1 %v2716_v49, %s2829_s21 }
 0x399   : > { %v3432_v51 = vpop.permute.xlu0 %1648 }
 0x39b   : > { %v3434_v53 = vpop.permute.xlu1 %1650 }
 0x39c   : > { %2203 = vrot.lane.b32.xlu1 %v2718_v50, %s2829_s21 }
 0x3a1   : > { %v3436_v31 = vpop.permute.xlu0 %1652 }
 0x3a3   : > { %v3438_v2 = vpop.permute.xlu1 %1654 }
 0x3a8   : > { %v1505_v48 = vpop.permute.xlu0 %1504 }
 0x3a9   : > { %v3442_v3 = vadd.f32 %v2442_v59, %v1505_v48 }
 0x3aa   : > { %v1507_v27 = vpop.permute.xlu1 %1506 }
 0x3ab   : > { %4204 = vst [vmem:[#allocation9_spill] sm:$0xff] %v3442_v3  ;;  %v3445_v29 = vmul.f32 -2.0, %v3442_v3  ;;  %v3449_v34 = vadd.f32 %v2443_v58, %v1507_v27 }
 0x3ac   : > { %v3451_v37 = vpop.permute.xlu0 %1656 }
 0x3ad   : > { %4205 = vst [vmem:[#allocation10_spill] sm:$0xff] %v3449_v34  ;;  %v3454_v11 = vsub.f32 0.0, %v3445_v29  ;;  %v3457_v13 = vmul.f32 -2.0, %v3449_v34 }
 0x3ae   : > { %v3459_v43 = vpop.permute.xlu1 %1658 }
 0x3af   : > { %v1824_v32 = vand.u32 2147483647, %v3454_v11  ;;  %v3463_v59 = vsub.f32 0.0, %v3457_v13  ;;  %vm1792_vm2 = vcmp.ne.f32.partialorder %v3454_v11, %v3454_v11 }
 0x3b0   : > { %v1509_v45 = vpop.permute.xlu0 %1508 }
 0x3b1   : > { %v1840_v46 = vsub.f32 0.0, %v1824_v32  ;;  %v3467_v57 = vadd.f32 %v2444_v0, %v1509_v45  ;;  %v1825_v58 = vand.u32 2147483647, %v3463_v59  ;;  %vm1793_vm4 = vcmp.ne.f32.partialorder %v3463_v59, %v3463_v59 }
 0x3b2   : > { %v1511_v47 = vpop.permute.xlu1 %1510 }
 0x3b3   : > { %4206 = vst [vmem:[#allocation11_spill] sm:$0xff] %v3467_v57  ;;  %v1856_v49 = vmul.f32 1.442695, %v1840_v46  ;;  %v3471_v50 = vmul.f32 -2.0, %v3467_v57  ;;  %v1841_v48 = vsub.f32 0.0, %v1825_v58  ;;  %v3475_v27 = vadd.f32 %v2445_v1, %v1511_v47 }
 0x3b4   : > { %v3477_v52 = vpop.permute.xlu0 %1660  ;;  %v1600_v58 = vmul.f32 -0.5, %v3148_v18  ;;  %v1602_v1 = vmul.f32 -0.5, %v3158_v9 }
 0x3b5   : > { %4207 = vst [vmem:[#allocation12_spill] sm:$0xff] %v3471_v50  ;;  %4208 = vst [vmem:[#allocation13_spill] sm:$0xff] %v3475_v27  ;;  %2719 = vpow2.f32 %v1856_v49  ;;  %v3480_v32 = vsub.f32 0.0, %v3471_v50  ;;  %v1858_v4 = vmul.f32 1.442695, %v1841_v48  ;;  %v3483_v0 = vmul.f32 -2.0, %v3475_v27 }
 0x3b6   : > { %4209 = vst [vmem:[#allocation14_spill] sm:$0xff] %v3477_v52  ;;  %v3486_v46 = vpop.permute.xlu1 %1662  ;;  %v1604_v48 = vmul.f32 -0.5, %v3168_v12  ;;  %v1618_v38 = vmul.f32 %v1602_v1, %v3158_v9  ;;  %v1621_v50 = vmul.f32 %v1605_v41, %v3171_v14  ;;  %v3523_v52 = vmul.f32 %v1606_v36, %v3178_v15 }
 0x3b7   : > { %4210 = vst [vmem:[#allocation15_spill] sm:$0xff] %v3480_v32  ;;  %4211 = vst [vmem:[#allocation16_spill] sm:$0xff] %v3483_v0  ;;  %v1826_v45 = vand.u32 2147483647, %v3480_v32  ;;  %2721 = vpow2.f32 %v1858_v4  ;;  %v3495_v6 = vsub.f32 0.0, %v3483_v0  ;;  %v1607_v4 = vmul.f32 -0.5, %v3181_v16 }
 0x3b8   : > { %4212 = vst [vmem:[#allocation17_spill] sm:$0xff] %v3486_v46  ;;  %v1513_v49 = vpop.permute.xlu0 %1512  ;;  %v1612_v0 = vmul.f32 -0.5, %v3208_v23  ;;  %v1616_v32 = vmul.f32 %v1600_v58, %v3148_v18  ;;  %v1617_v46 = vmul.f32 %v1601_v7, %v3151_v8  ;;  %v4214_v8 = vclamps-f32 %v3296_v42, 9.0 }
 0x3b9   : > { %v1842_v47 = vsub.f32 0.0, %v1826_v45  ;;  %v1610_v45 = vmul.f32 -0.5, %v3198_v21  ;;  %v3505_v44 = vadd.f32 %v2446_v60, %v1513_v49  ;;  %v1827_v27 = vand.u32 2147483647, %v3495_v6 }
 0x3ba   : > { %v1515_v55 = vpop.permute.xlu1 %1514  ;;  %v1619_v60 = vmul.f32 %v1603_v33, %v3161_v10  ;;  %v1620_v49 = vmul.f32 %v1604_v48, %v3168_v12  ;;  %v3534_v10 = vmul.f32 %v1607_v4, %v3181_v16  ;;  %v3537_v12 = vmul.f32 %v1608_v30, %v3188_v19 }
 0x3bb   : > { %v1860_v28 = vmul.f32 1.442695, %v1842_v47  ;;  %4213 = vst [vmem:[#allocation18_spill] sm:$0xff] %v3505_v44  ;;  %v1615_v47 = vmul.f32 -0.5, %v3221_v26  ;;  %v3526_v18 = vmul.f32 -2.0, %v3505_v44  ;;  %v3530_v58 = vadd.f32 %v4214_v8, %v1515_v55 }
 0x3bc   : > { %v3540_v14 = vmul.f32 %v1609_v5, %v3191_v20  ;;  %v1696_v36 = vsub.f32 %v1616_v32, %v3432_v51  ;;  %v1697_v42 = vsub.f32 %v1617_v46, %v3434_v53  ;;  %v1843_v55 = vsub.f32 0.0, %v1827_v27 }
 0x3bd   : > { %2723 = vpow2.f32 %v1860_v28  ;;  %v3520_v28 = vpop.permute.xlu0 %1664  ;;  %v1698_v41 = vsub.f32 %v1618_v38, %v3436_v31  ;;  %v3550_v19 = vmul.f32 %v1610_v45, %v3198_v21  ;;  %v3553_v20 = vmul.f32 %v1611_v54, %v3201_v22 }
 0x3be   : > { %v1699_v5 = vsub.f32 %v1619_v60, %v3438_v2  ;;  %v3557_v30 = vsub.f32 0.0, %v3526_v18  ;;  %v3560_v51 = vmul.f32 -2.0, %v3530_v58  ;;  %v3562_v53 = vpop.permute.xlu1 %1666  ;;  %v3565_v31 = vmul.f32 %v1612_v0, %v3208_v23 }
 0x3bf   : > { %v3514_v40 = vpop.eup %2719  ;;  %4215 = vst [vmem:[#allocation19_spill] sm:$0xff] %v3550_v19  ;;  %4216 = vst [vmem:[#allocation20_spill] sm:$0xff] %v3553_v20  ;;  %v3570_v22 = vmul.f32 %v1613_v39, %v3211_v24  ;;  %v3573_v54 = vmul.f32 %v1614_v63, %v3218_v25  ;;  %v3575_v2 = vadd.f32 -0.9189385, %v1696_v36  ;;  %v3577_v46 = vadd.f32 -0.9189385, %v1697_v42 }
 0x3c0   : > { %v1888_v9 = vadd.f32 1.0, %v3514_v40  ;;  %4217 = vst [vmem:[#allocation21_spill] sm:$0xff] %v3565_v31  ;;  %v1891_v21 = vmul.f32 -0.5, %v3514_v40  ;;  %v1862_v7 = vmul.f32 1.442695, %v1843_v55  ;;  %v3580_v1 = vmul.f32 %v1615_v47, %v3221_v26 }
 0x3c1   : > { %v3543_v33 = vpop.eup %2721  ;;  %v1517_v27 = vpop.permute.xlu0 %1516  ;;  %4218 = vst [vmem:[#allocation22_spill] sm:$0xff] %v3570_v22  ;;  %4219 = vst [vmem:[#allocation23_spill] sm:$0xff] %v3573_v54  ;;  %v3584_v0 = vadd.f32 -0.9189385, %v1698_v41  ;;  %v1700_v48 = vsub.f32 %v1620_v49, %v3451_v37  ;;  %v1701_v24 = vsub.f32 %v1621_v50, %v3459_v43  ;;  %v3588_v39 = vadd.f32 -0.9189385, %v1699_v5 }
 0x3c2   : > { %2725 = vlog2.f32 %v1888_v9  ;;  %v1897_v32 = vadd.f32 1.0, %v3543_v33  ;;  %4220 = vst [vmem:[#allocation24_spill] sm:$0xff] %v3580_v1  ;;  %v1828_v25 = vand.u32 2147483647, %v3557_v30  ;;  %v3592_v63 = vsub.f32 0.0, %v3560_v51  ;;  %v1519_v50 = vpop.permute.xlu1 %1518  ;;  %v4226_v43 = vld [vmem:[#allocation2_spill] sm:$0xff] }
 0x3c3   : > { %v4221_v4 = vclamps-f32 %v3303_v56, 9.0  ;;  %v1728_v45 = vsub.f32 0.6931472, %v3442_v3  ;;  %v1760_v47 = vmax.f32 %v3445_v29, 0.0  ;;  %v1892_v38 = vadd.f32 1.0, %v1891_v21  ;;  %v4229_v1 = vld [vmem:[#allocation17_spill] sm:$0xff] }
 0x3c4   : > { %2727 = vlog2.f32 %v1897_v32  ;;  %v1894_v49 = vand.u32 2147483647, %v3514_v40  ;;  %v1900_v8 = vmul.f32 -0.5, %v3543_v33  ;;  %v1761_v56 = vmax.f32 %v3457_v13, 0.0 }
 0x3c5   : > { %v3596_v26 = vadd.f32 %v4221_v4, %v1517_v27  ;;  %2729 = vpow2.f32 %v1862_v7  ;;  %v3605_v9 = vadd.f32 -0.9189385, %v1700_v48  ;;  %v3607_v36 = vadd.f32 -0.9189385, %v1701_v24 }
 0x3c6   : > { %v1844_v55 = vsub.f32 0.0, %v1828_v25  ;;  %v1829_v41 = vand.u32 2147483647, %v3592_v63  ;;  %v4222_v27 = vclamps-f32 %v3307_v61, 9.0  ;;  %v4223_v32 = vclamps-f32 %v3315_v35, 9.0  ;;  %v4224_v61 = vld [vmem:[#allocation14_spill] sm:$0xff] }
 0x3c7   : > { %v3582_v23 = vpop.eup %2723  ;;  %v3613_v5 = vmul.f32 -2.0, %v3596_v26  ;;  %v1893_v24 = vmul.f32 %v3514_v40, %v1892_v38  ;;  %vm1895_vm3 = vcmp.lt.f32.partialorder %v1894_v49, 0.0004427343  ;;  %v1901_v25 = vadd.f32 1.0, %v1900_v8 }
 0x3c8   : > { %v1906_v37 = vadd.f32 1.0, %v3582_v23  ;;  %v1521_v60 = vpop.permute.xlu0 %1520  ;;  %v3617_v21 = vadd.f32 %v4222_v27, %v1519_v50  ;;  %v1909_v16 = vmul.f32 -0.5, %v3582_v23  ;;  %v1702_v50 = vsub.f32 %v3523_v52, %v4224_v61  ;;  %v4228_v61 = vld [vmem:[#allocation13_spill] sm:$0xff] }
 0x3c9   : > { %v3621_v7 = vadd.f32 %v4223_v32, %v1521_v60  ;;  %v1903_v35 = vand.u32 2147483647, %v3543_v33  ;;  %v4225_v60 = vld [vmem:[#allocation12_spill] sm:$0xff]  ;;  %v1864_v32 = vmul.f32 1.442695, %v1844_v55  ;;  %v3633_v40 = vsub.f32 0.0, %v3613_v5 }
 0x3ca   : > { %2731 = vlog2.f32 %v1906_v37  ;;  %v1523_v4 = vpop.permute.xlu1 %1522  ;;  %v1845_v15 = vsub.f32 0.0, %v1829_v41  ;;  %v3636_v8 = vmul.f32 -2.0, %v3617_v21  ;;  %v4227_v52 = vclamps-f32 %v4226_v43, 9.0 }
 0x3cb   : > { %v3639_v37 = vmul.f32 -2.0, %v3621_v7  ;;  %v1910_v41 = vadd.f32 1.0, %v1909_v16  ;;  %v3651_v3 = vadd.f32 -0.9189385, %v1702_v50  ;;  %v1703_v54 = vsub.f32 %v3534_v10, %v4229_v1 }
 0x3cc   : > { %v2726_v42 = vpop.eup %2725  ;;  %vm1904_vm6 = vcmp.lt.f32.partialorder %v1903_v35, 0.0004427343  ;;  %2733 = vpow2.f32 %v1864_v32  ;;  %v3662_v16 = vsub.f32 0.0, %v3636_v8  ;;  %v1866_v35 = vmul.f32 1.442695, %v1845_v15  ;;  %v4233_v15 = vld [vmem:[#allocation4_spill] sm:$0xff] }
 0x3cd   : > { %v1890_v48 = vmul.f32 0.6931472, %v2726_v42  ;;  %v1762_v42 = vmax.f32 %v4225_v60, 0.0  ;;  %v4234_v31 = vclamps-f32 %v4233_v15, 9.0  ;;  %vm1795_vm9 = vcmp.ne.f32.partialorder %v3495_v6, %v3495_v6 }
 0x3ce   : > { %v2728_v49 = vpop.eup %2727  ;;  %vm1796_vm11 = vcmp.ne.f32.partialorder %v3557_v30, %v3557_v30  ;;  %vm1797_vm13 = vcmp.ne.f32.partialorder %v3592_v63, %v3592_v63  ;;  %vm1798_vm14 = vcmp.ne.f32.partialorder %v3633_v40, %v3633_v40 }
 0x3cf   : > { %v1896_v27 = vsel %vm1895_vm3, %v1893_v24, %v1890_v48  ;;  %v3643_v48 = vadd.f32 %v4227_v52, %v1523_v4  ;;  %v1899_v24 = vmul.f32 0.6931472, %v2728_v49  ;;  %v3655_v4 = vpop.eup %2729  ;;  %v1830_v52 = vand.u32 2147483647, %v3633_v40 }
 0x3d0   : > { %v2032_v38 = vadd.f32 %v1896_v27, %v1760_v47  ;;  %v1902_v47 = vmul.f32 %v3543_v33, %v1901_v25  ;;  %v1525_v43 = vpop.permute.xlu0 %1524  ;;  %v1912_v33 = vand.u32 2147483647, %v3582_v23  ;;  %v3665_v25 = vsub.f32 0.0, %v3639_v37 }
 0x3d1   : > { %vm1799_vm3 = vcmp.ne.f32.partialorder %v3662_v16, %v3662_v16 }
 0x3d2   : > { %v2048_v55 = vsel %vm1792_vm2, %v3445_v29, %v2032_v38  ;;  %v1905_v11 = vsel %vm1904_vm6, %v1902_v47, %v1899_v24  ;;  %v4230_v29 = vld [vmem:[#allocation15_spill] sm:$0xff]  ;;  %v1527_v10 = vpop.permute.xlu1 %1526  ;;  %v3668_v38 = vmul.f32 -2.0, %v3643_v48  ;;  %v1911_v24 = vmul.f32 %v3582_v23, %v1910_v41 }
 0x3d3   : > { %v2064_v22 = vsub.f32 %v1728_v45, %v2048_v55  ;;  %vm1794_vm7 = vcmp.ne.f32.partialorder %v4230_v29, %v4230_v29  ;;  %v2033_v1 = vadd.f32 %v1905_v11, %v1761_v56  ;;  %v4231_v45 = vld [vmem:[#allocation3_spill] sm:$0xff]  ;;  %v1915_v56 = vadd.f32 1.0, %v3655_v4 }
 0x3d4   : > { %v2732_v50 = vpop.eup %2731  ;;  %v4232_v49 = vclamps-f32 %v4231_v45, 9.0  ;;  %v1846_v11 = vsub.f32 0.0, %v1830_v52  ;;  %v3682_v20 = vadd.f32 %v4234_v31, %v1527_v10  ;;  %vm1913_vm8 = vcmp.lt.f32.partialorder %v1912_v33, 0.0004427343  ;;  %v4236_v52 = vld [vmem:[#allocation5_spill] sm:$0xff] }
 0x3d5   : > { %v2080_v32 = vmul.f32 2.0, %v2064_v22  ;;  %v2049_v47 = vsel %vm1793_vm4, %v3457_v13, %v2033_v1  ;;  %v1908_v27 = vmul.f32 0.6931472, %v2732_v50  ;;  %v1831_v22 = vand.u32 2147483647, %v3662_v16 }
 0x3d6   : > { %v3672_v55 = vadd.f32 %v4232_v49, %v1525_v43  ;;  %v4235_v43 = vsub.f32 0.6931472, %v3449_v34  ;;  %v1832_v23 = vand.u32 2147483647, %v3665_v25  ;;  %v3690_v41 = vsub.f32 0.0, %v3668_v38  ;;  %v4238_v49 = vld [vmem:[#allocation16_spill] sm:$0xff] }
 0x3d7   : > { %v2096_v59 = vsub.f32 %v3575_v2, %v2080_v32  ;;  %v1914_v13 = vsel %vm1913_vm8, %v1911_v24, %v1908_v27  ;;  %v4237_v1 = vclamps-f32 %v4236_v52, 9.0  ;;  %2735 = vlog2.f32 %v1915_v56 }
 0x3d8   : > { %v1529_v19 = vpop.permute.xlu0 %1528  ;;  %v2065_v45 = vsub.f32 %v4235_v43, %v2049_v47  ;;  %v2034_v10 = vadd.f32 %v1914_v13, %v1762_v42  ;;  %v3697_v47 = vadd.f32 -0.9189385, %v1703_v54  ;;  %v3700_v33 = vmul.f32 -2.0, %v3672_v55 }
 0x3d9   : > { %v3694_v50 = vadd.f32 %v4237_v1, %v1529_v19  ;;  %v3704_v27 = vmul.f32 -2.0, %v3682_v20  ;;  %v2113_v32 = vsel %vm2112_vm5, %v2096_v59, 0.0  ;;  %2737 = vpow2.f32 %v1866_v35  ;;  %v3718_v59 = vpop.eup %2733 }
 0x3da   : > { %v2081_v31 = vmul.f32 2.0, %v2065_v45  ;;  %v1531_v24 = vpop.permute.xlu1 %1530  ;;  %v1704_v42 = vsub.f32 %v3537_v12, %v3520_v28  ;;  %v1847_v54 = vsub.f32 0.0, %v1831_v22  ;;  %2114 = vadd.xlane.f32.xlu0 %v2113_v32  ;;  %v2050_v56 = vsel %vm1794_vm7, %v4225_v60, %v2034_v10  ;;  %v4239_v28 = vld [vmem:[#allocation6_spill] sm:$0xff] }
 0x3db   : > { %v1868_v43 = vmul.f32 1.442695, %v1846_v11  ;;  %v1848_v45 = vsub.f32 0.0, %v1832_v23  ;;  %v1833_v13 = vand.u32 2147483647, %v3690_v41  ;;  %v3716_v52 = vmul.f32 -2.0, %v3694_v50 }
 0x3dc   : > { %v2097_v19 = vsub.f32 %v3577_v46, %v2081_v31  ;;  %v3721_v46 = vsub.f32 0.0, %v3700_v33  ;;  %v4240_v12 = vclamps-f32 %v4239_v28, 9.0  ;;  %v4241_v60 = vsub.f32 0.6931472, %v3467_v57 }
 0x3dd   : > { %v3733_v1 = vsub.f32 0.0, %v3704_v27  ;;  %v1918_v10 = vmul.f32 -0.5, %v3655_v4  ;;  %v3736_v32 = vadd.f32 -0.9189385, %v1704_v42  ;;  %2739 = vpow2.f32 %v1868_v43 }
 0x3de   : > { %v3725_v35 = vadd.f32 %v4240_v12, %v1531_v24  ;;  %v2116_v22 = vsel %vm2112_vm5, %v2097_v19, 0.0  ;;  %v2066_v29 = vsub.f32 %v4241_v60, %v2050_v56  ;;  %v1705_v24 = vsub.f32 %v3540_v14, %v3562_v53 }
 0x3df   : > { %4242 = vst [vmem:[#allocation14_spill] sm:$0xff] %v3733_v1  ;;  %2117 = vadd.xlane.f32.xlu1 %v2116_v22  ;;  %v1870_v19 = vmul.f32 1.442695, %v1847_v54  ;;  %v1872_v56 = vmul.f32 1.442695, %v1848_v45  ;;  %v3741_v12 = vsub.f32 0.0, %v3716_v52  ;;  %vm1800_vm6 = vcmp.ne.f32.partialorder %v3665_v25, %v3665_v25 }
 0x3e0   : > { %v1533_v31 = vpop.permute.xlu0 %1532  ;;  %v2082_v28 = vmul.f32 2.0, %v2066_v29  ;;  %v4244_v60 = vclamps-f32 %v3355_v62, 9.0  ;;  %v1849_v11 = vsub.f32 0.0, %v1833_v13  ;;  %v1834_v42 = vand.u32 2147483647, %v3721_v46 }
 0x3e1   : > { %4243 = vst [vmem:[#allocation12_spill] sm:$0xff] %v3741_v12  ;;  %v3750_v15 = vmul.f32 -2.0, %v3725_v35  ;;  %v1835_v14 = vand.u32 2147483647, %v3733_v1  ;;  %v4246_v53 = vclamps-f32 %v3359_v17, 9.0  ;;  %v1919_v29 = vadd.f32 1.0, %v1918_v10  ;;  %v2736_v13 = vpop.eup %2735 }
 0x3e2   : > { %v3745_v23 = vadd.f32 %v4244_v60, %v1533_v31  ;;  %v1535_v22 = vpop.permute.xlu1 %1534  ;;  %v2098_v43 = vsub.f32 %v3584_v0, %v2082_v28  ;;  %v3762_v31 = vadd.f32 -0.9189385, %v1705_v24  ;;  %2741 = vpow2.f32 %v1870_v19 }
 0x3e3   : > { %v3755_v54 = vadd.f32 %v4246_v53, %v1535_v22  ;;  %v1921_v60 = vand.u32 2147483647, %v3655_v4  ;;  %v1924_v2 = vadd.f32 1.0, %v3718_v59  ;;  %2743 = vpow2.f32 %v1872_v56  ;;  %v3773_v53 = vpop.eup %2737 }
 0x3e4   : > { %4245 = vst [vmem:[#allocation2_spill] sm:$0xff] %v3745_v23  ;;  %v3758_v45 = vpop.permute.xlu0 %1668  ;;  %v1836_v22 = vand.u32 2147483647, %v3741_v12  ;;  %v3769_v0 = vmul.f32 -2.0, %v3745_v23  ;;  %v1850_v10 = vsub.f32 0.0, %v1834_v42  ;;  %v3776_v24 = vsub.f32 0.0, %v3750_v15 }
 0x3e5   : > { %4247 = vst [vmem:[#allocation17_spill] sm:$0xff] %v3755_v54  ;;  %v3779_v19 = vmul.f32 -2.0, %v3755_v54  ;;  %v2119_v34 = vsel %vm2112_vm5, %v2098_v43, 0.0  ;;  %v1874_v57 = vmul.f32 1.442695, %v1849_v11  ;;  %v1851_v56 = vsub.f32 0.0, %v1835_v14 }
 0x3e6   : > { %v3771_v28 = vpop.permute.xlu1 %1670  ;;  %4248 = vst [vmem:[#allocation15_spill] sm:$0xff] %v3776_v24  ;;  %2120 = vadd.xlane.f32.xlu0 %v2119_v34  ;;  %v1917_v62 = vmul.f32 0.6931472, %v2736_v13  ;;  %v1920_v17 = vmul.f32 %v3655_v4, %v1919_v29  ;;  %vm1922_vm10 = vcmp.lt.f32.partialorder %v1921_v60, 0.0004427343  ;;  %2745 = vlog2.f32 %v1924_v2 }
 0x3e7   : > { %4249 = vst [vmem:[#allocation3_spill] sm:$0xff] %v3779_v19  ;;  %2747 = vtanh.f32 %v3672_v55  ;;  %v1852_v54 = vsub.f32 0.0, %v1836_v22  ;;  %v3789_v1 = vsub.f32 0.0, %v3769_v0  ;;  %v1876_v34 = vmul.f32 1.442695, %v1850_v10  ;;  %v3799_v60 = vpop.eup %2739 }
 0x3e8   : > { %v3783_v12 = vpop.permute.xlu0 %1672  ;;  %v1923_v11 = vsel %vm1922_vm10, %v1920_v17, %v1917_v62  ;;  %v1837_v4 = vand.u32 2147483647, %v3776_v24  ;;  %v3795_v43 = vsub.f32 0.0, %v3779_v19  ;;  %v4253_v29 = vmax.f32 %v4238_v49, 0.0 }
 0x3e9   : > { %4250 = vst [vmem:[#allocation4_spill] sm:$0xff] %v3789_v1  ;;  %2749 = vpow2.f32 %v1874_v57  ;;  %v1878_v2 = vmul.f32 1.442695, %v1851_v56  ;;  %v1927_v22 = vmul.f32 -0.5, %v3718_v59  ;;  %v1933_v62 = vadd.f32 1.0, %v3773_v53 }
 0x3ea   : > { %v3791_v14 = vpop.permute.xlu1 %1674  ;;  %4252 = vst [vmem:[#allocation16_spill] sm:$0xff] %v3795_v43  ;;  %v2035_v13 = vadd.f32 %v1923_v11, %v4253_v29  ;;  %2751 = vtanh.f32 %v3682_v20  ;;  %v1880_v29 = vmul.f32 1.442695, %v1852_v54  ;;  %v1838_v57 = vand.u32 2147483647, %v3789_v1 }
 0x3eb   : > { %4251 = vst [vmem:[#allocation5_spill] sm:$0xff] %v3791_v14  ;;  %v4255_v56 = vsub.f32 0.6931472, %v4228_v61  ;;  %2753 = vlog2.f32 %v1933_v62  ;;  %v1853_v10 = vsub.f32 0.0, %v1837_v4  ;;  %v1839_v17 = vand.u32 2147483647, %v3795_v43 }
 0x3ec   : > { %v3802_v42 = vpop.permute.xlu0 %1676  ;;  %v2051_v11 = vsel %vm1795_vm9, %v4238_v49, %v2035_v13  ;;  %v3817_v19 = vpop.eup %2741  ;;  %2755 = vpow2.f32 %v1876_v34  ;;  %v1942_v24 = vadd.f32 1.0, %v3799_v60  ;;  %v1928_v49 = vadd.f32 1.0, %v1927_v22 }
 0x3ed   : > { %4254 = vst [vmem:[#allocation6_spill] sm:$0xff] %v3802_v42  ;;  %v2067_v23 = vsub.f32 %v4255_v56, %v2051_v11  ;;  %v3821_v14 = vpop.eup %2743  ;;  %2757 = vpow2.f32 %v1878_v2  ;;  %v1936_v54 = vmul.f32 -0.5, %v3773_v53  ;;  %v1930_v4 = vand.u32 2147483647, %v3718_v59 }
 0x3ee   : > { %v3815_v42 = vpop.permute.xlu1 %1678  ;;  %2759 = vlog2.f32 %v1942_v24  ;;  %v1854_v2 = vsub.f32 0.0, %v1838_v57  ;;  %v1882_v61 = vmul.f32 1.442695, %v1853_v10  ;;  %v1855_v43 = vsub.f32 0.0, %v1839_v17 }
 0x3ef   : > { %4256 = vst [vmem:[#allocation25_spill] sm:$0xff] %v3815_v42  ;;  %v2083_v6 = vmul.f32 2.0, %v2067_v23  ;;  %2761 = vpow2.f32 %v1880_v29  ;;  %v1951_v62 = vadd.f32 1.0, %v3817_v19  ;;  %v1929_v11 = vmul.f32 %v3718_v59, %v1928_v49 }
 0x3f0   : > { %v3826_v13 = vpop.permute.xlu0 %2179  ;;  %v2746_v22 = vpop.eup %2745  ;;  %v1937_v29 = vadd.f32 1.0, %v1936_v54  ;;  %vm1931_vm12 = vcmp.lt.f32.partialorder %v1930_v4, 0.0004427343  ;;  %v1954_v17 = vmul.f32 -0.5, %v3817_v19  ;;  %v1960_v49 = vadd.f32 1.0, %v3821_v14 }
 0x3f1   : > { %4257 = vst [vmem:[#allocation26_spill] sm:$0xff] %v3826_v13  ;;  %v2099_v23 = vsub.f32 %v3588_v39, %v2083_v6  ;;  %v1945_v13 = vmul.f32 -0.5, %v3799_v60  ;;  %v3837_v42 = vpop.eup %2747  ;;  %v1926_v24 = vmul.f32 0.6931472, %v2746_v22  ;;  %2763 = vlog2.f32 %v1951_v62 }
 0x3f2   : > { %v3833_v56 = vpop.permute.xlu1 %2177  ;;  %v1884_v6 = vmul.f32 1.442695, %v1854_v2  ;;  %v1939_v22 = vand.u32 2147483647, %v3773_v53  ;;  %2765 = vpow2.f32 %v1882_v61  ;;  %v4261_v4 = vmax.f32 %v3526_v18, 0.0 }
 0x3f3   : > { %4258 = vst [vmem:[#allocation27_spill] sm:$0xff] %v3833_v56  ;;  %v2122_v34 = vsel %vm2112_vm5, %v2099_v23, 0.0  ;;  %v3847_v10 = vpop.eup %2749  ;;  %v1932_v23 = vsel %vm1931_vm12, %v1929_v11, %v1926_v24  ;;  %v1946_v39 = vadd.f32 1.0, %v1945_v13  ;;  %v1886_v56 = vmul.f32 1.442695, %v1855_v43 }
 0x3f4   : > { %v3841_v57 = vpop.permute.xlu0 %2185  ;;  %2123 = vadd.xlane.f32.xlu0 %v2122_v34  ;;  %v3853_v54 = vpop.eup %2751  ;;  %v2036_v62 = vadd.f32 %v1932_v23, %v4261_v4  ;;  %v1938_v2 = vmul.f32 %v3773_v53, %v1937_v29  ;;  %v1948_v11 = vand.u32 2147483647, %v3799_v60  ;;  %2767 = vlog2.f32 %v1960_v49 }
 0x3f5   : > { %4259 = vst [vmem:[#allocation28_spill] sm:$0xff] %v3841_v57  ;;  %v2754_v57 = vpop.eup %2753  ;;  %v1955_v23 = vadd.f32 1.0, %v1954_v17  ;;  %v1969_v43 = vadd.f32 1.0, %v3847_v10  ;;  %2769 = vpow2.f32 %v1884_v6  ;;  %v4263_v29 = vsub.f32 0.6931472, %v3505_v44 }
 0x3f6   : > { %v3850_v59 = vpop.permute.xlu1 %2181  ;;  %v2052_v61 = vsel %vm1796_vm11, %v3526_v18, %v2036_v62  ;;  %v1935_v13 = vmul.f32 0.6931472, %v2754_v57  ;;  %vm1940_vm15 = vcmp.lt.f32.partialorder %v1939_v22, 0.0004427343  ;;  %v1963_v49 = vmul.f32 -0.5, %v3821_v14 }
 0x3f7   : > { %4260 = vst [vmem:[#allocation29_spill] sm:$0xff] %v3850_v59  ;;  %v3864_v59 = vpop.eup %2755  ;;  %v2068_v4 = vsub.f32 %v4263_v29, %v2052_v61  ;;  %v1947_v30 = vmul.f32 %v3799_v60, %v1946_v39  ;;  %v1957_v18 = vand.u32 2147483647, %v3817_v19  ;;  %2771 = vlog2.f32 %v1969_v43 }
 0x3f8   : > { %v3862_v24 = vpop.permute.xlu0 %2189  ;;  %v3871_v53 = vpop.eup %2757  ;;  %v1941_v1 = vsel %vm1940_vm15, %v1938_v2, %v1935_v13  ;;  %v4264_v6 = vmax.f32 %v3560_v51, 0.0  ;;  %v1972_v22 = vmul.f32 -0.5, %v3847_v10  ;;  %2773 = vpow2.f32 %v1886_v56 }
 0x3f9   : > { %4262 = vst [vmem:[#allocation30_spill] sm:$0xff] %v3862_v24  ;;  %v2760_v24 = vpop.eup %2759  ;;  %v2084_v17 = vmul.f32 2.0, %v2068_v4  ;;  %vm1949_vm1 = vcmp.lt.f32.partialorder %v1948_v11, 0.0004427343  ;;  %v1956_v2 = vmul.f32 %v3817_v19, %v1955_v23  ;;  %v1978_v60 = vadd.f32 1.0, %v3864_v59 }
 0x3fa   : > { %v3876_v34 = vpop.permute.xlu1 %2183  ;;  %v3880_v57 = vpop.eup %2761  ;;  %v2037_v62 = vadd.f32 %v1941_v1, %v4264_v6  ;;  %v1944_v44 = vmul.f32 0.6931472, %v2760_v24  ;;  %v1964_v1 = vadd.f32 1.0, %v1963_v49  ;;  %v4265_v4 = vsub.f32 0.6931472, %v3530_v58 }
 0x3fb   : > { %v2100_v39 = vsub.f32 %v3605_v9, %v2084_v17  ;;  %v2764_v29 = vpop.eup %2763  ;;  %v4266_v11 = vmax.f32 %v3613_v5, 0.0  ;;  %vm3900_vm2 = vcmp.lt.f32.partialorder %v1957_v18, 0.0004427343  ;;  %2775 = vlog2.f32 %v1978_v60 }
 0x3fc   : > { %v3884_v61 = vpop.permute.xlu0 %2193  ;;  %v2053_v13 = vsel %vm1797_vm13, %v3560_v51, %v2037_v62  ;;  %v1950_v43 = vsel %vm1949_vm1, %v1947_v30, %v1944_v44  ;;  %v1953_v63 = vmul.f32 0.6931472, %v2764_v29  ;;  %v1966_v44 = vand.u32 2147483647, %v3821_v14  ;;  %v3906_v30 = vpop.eup %2765 }
 0x3fd   : > { %v2069_v56 = vsub.f32 %v4265_v4, %v2053_v13  ;;  %v2038_v19 = vadd.f32 %v1950_v43, %v4266_v11  ;;  %v2125_v9 = vsel %vm2112_vm5, %v2100_v39, 0.0  ;;  %v1973_v51 = vadd.f32 1.0, %v1972_v22 }
 0x3fe   : > { %v3894_v24 = vpop.permute.xlu1 %2187  ;;  %2126 = vadd.xlane.f32.xlu1 %v2125_v9  ;;  %v1981_v62 = vmul.f32 -0.5, %v3864_v59  ;;  %v2768_v60 = vpop.eup %2767  ;;  %v4269_v39 = vsub.f32 0.6931472, %v3596_v26  ;;  %v1959_v13 = vsel %vm3900_vm2, %v1956_v2, %v1953_v63  ;;  %v1965_v43 = vmul.f32 %v3821_v14, %v1964_v1 }
 0x3ff   : > { %v2085_v17 = vmul.f32 2.0, %v2069_v56  ;;  %v2054_v18 = vsel %vm1798_vm14, %v3613_v5, %v2038_v19  ;;  %v1962_v4 = vmul.f32 0.6931472, %v2768_v60  ;;  %v1975_v56 = vand.u32 2147483647, %v3847_v10  ;;  %v3930_v11 = vpop.eup %2769 }
 0x400   : > { %v2198_v49 = vpop.permute.xlu0 %2197  ;;  %v2070_v22 = vsub.f32 %v4269_v39, %v2054_v18  ;;  %vm1967_vm4 = vcmp.lt.f32.partialorder %v1966_v44, 0.0004427343  ;;  %v1974_v16 = vmul.f32 %v3847_v10, %v1973_v51  ;;  %v1987_v2 = vadd.f32 1.0, %v3871_v53 }
 0x401   : > { %v3914_v6 = vsel %vm2112_vm5, %v3837_v42, %v2198_v49  ;;  %v2101_v5 = vsub.f32 %v3607_v36, %v2085_v17  ;;  %v4270_v42 = vmax.f32 %v3636_v8, 0.0  ;;  %v2772_v23 = vpop.eup %2771  ;;  %v1968_v36 = vsel %vm1967_vm4, %v1965_v43, %v1962_v4 }
 0x402   : > { %v3924_v40 = vpop.permute.xlu1 %2191  ;;  %v2086_v19 = vmul.f32 2.0, %v2070_v22  ;;  %v1982_v9 = vadd.f32 1.0, %v1981_v62  ;;  %v4271_v49 = vsub.f32 0.6931472, %v3617_v21  ;;  %v4272_v18 = vmax.f32 %v3639_v37, 0.0  ;;  %v3943_v51 = vpop.eup %2773 }
 0x403   : > { %v2039_v29 = vadd.f32 %v1959_v13, %v4270_v42  ;;  %v2128_v14 = vsel %vm2112_vm5, %v2101_v5, 0.0  ;;  %v1971_v60 = vmul.f32 0.6931472, %v2772_v23  ;;  %vm1976_vm7 = vcmp.lt.f32.partialorder %v1975_v56, 0.0004427343 }
 0x404   : > { %2129 = vadd.xlane.f32.xlu0 %v2128_v14  ;;  %v2102_v63 = vsub.f32 %v3651_v3, %v2086_v19  ;;  %v2040_v44 = vadd.f32 %v1968_v36, %v4272_v18  ;;  %2777 = vlog2.f32 %v1987_v2  ;;  %v4273_v43 = vsub.f32 0.6931472, %v3621_v7 }
 0x405   : > { %v2055_v1 = vsel %vm1799_vm3, %v3636_v8, %v2039_v29  ;;  %v1984_v8 = vand.u32 2147483647, %v3864_v59  ;;  %v1977_v22 = vsel %vm1976_vm7, %v1974_v16, %v1971_v60  ;;  %v2776_v13 = vpop.eup %2775  ;;  %vm1801_vm8 = vcmp.ne.f32.partialorder %v3690_v41, %v3690_v41 }
 0x406   : > { %v2071_v17 = vsub.f32 %v4271_v49, %v2055_v1  ;;  %v3941_v10 = vpop.permute.xlu1 %2195  ;;  %v2131_v3 = vsel %vm2112_vm5, %v2102_v63, 0.0  ;;  %v2056_v39 = vsel %vm1800_vm6, %v3639_v37, %v2040_v44  ;;  %v4274_v25 = vmax.f32 %v3668_v38, 0.0 }
 0x407   : > { %2132 = vadd.xlane.f32.xlu1 %v2131_v3  ;;  %v2072_v5 = vsub.f32 %v4273_v43, %v2056_v39  ;;  %v1983_v29 = vmul.f32 %v3864_v59, %v1982_v9  ;;  %v1980_v56 = vmul.f32 0.6931472, %v2776_v13  ;;  %v1990_v19 = vmul.f32 -0.5, %v3871_v53 }
 0x408   : > { %v2087_v62 = vmul.f32 2.0, %v2071_v17  ;;  %v2041_v42 = vadd.f32 %v1977_v22, %v4274_v25  ;;  %v1996_v37 = vadd.f32 1.0, %v3880_v57  ;;  %v1739_v16 = vsub.f32 0.6931472, %v3682_v20 }
 0x409   : > { %v2088_v2 = vmul.f32 2.0, %v2072_v5  ;;  %vm1985_vm9 = vcmp.lt.f32.partialorder %v1984_v8, 0.0004427343  ;;  %v4275_v1 = vsub.f32 0.6931472, %v3643_v48  ;;  %vm1802_vm10 = vcmp.ne.f32.partialorder %v3721_v46, %v3721_v46 }
 0x40a   : > { %v2103_v4 = vsub.f32 %v3697_v47, %v2087_v62  ;;  %v2057_v23 = vsel %vm1801_vm8, %v3668_v38, %v2041_v42  ;;  %v2200_v14 = vpop.permute.xlu1 %2199  ;;  %v1986_v59 = vsel %vm1985_vm9, %v1983_v29, %v1980_v56  ;;  %2779 = vlog2.f32 %v1996_v37  ;;  %v4276_v47 = vld [vmem:[#allocation19_spill] sm:$0xff] }
 0x40b   : > { %v2073_v36 = vsub.f32 %v4275_v1, %v2057_v23  ;;  %v1706_v9 = vsub.f32 %v4276_v47, %v3758_v45  ;;  %v2104_v63 = vsub.f32 %v3736_v32, %v2088_v2  ;;  %v4277_v20 = vmax.f32 %v3700_v33, 0.0 }
 0x40c   : > { %v2134_v41 = vsel %vm2112_vm5, %v2103_v4, 0.0  ;;  %v1991_v17 = vadd.f32 1.0, %v1990_v19  ;;  %v3974_v18 = vsel %vm2112_vm5, %v3853_v54, %v2200_v14  ;;  %v2005_v44 = vadd.f32 1.0, %v3906_v30  ;;  %v4279_v14 = vld [vmem:[#allocation20_spill] sm:$0xff] }
 0x40d   : > { %2135 = vadd.xlane.f32.xlu0 %v2134_v41  ;;  %v2042_v38 = vadd.f32 %v1986_v59, %v4277_v20  ;;  %v2089_v49 = vmul.f32 2.0, %v2073_v36  ;;  %v2137_v60 = vsel %vm2112_vm5, %v2104_v63, 0.0  ;;  %v1993_v32 = vand.u32 2147483647, %v3871_v53  ;;  %v4280_v59 = vld [vmem:[#allocation14_spill] sm:$0xff] }
 0x40e   : > { %v1999_v8 = vmul.f32 -0.5, %v3880_v57  ;;  %v1771_v46 = vmax.f32 %v3704_v27, 0.0  ;;  %2138 = vadd.xlane.f32.xlu1 %v2137_v60  ;;  %v4278_v62 = vsub.f32 0.6931472, %v3672_v55  ;;  %2781 = vlog2.f32 %v2005_v44  ;;  %v2778_v54 = vpop.eup %2777  ;;  %v4281_v44 = vld [vmem:[#allocation2_spill] sm:$0xff] }
 0x40f   : > { %v2058_v45 = vsel %vm1802_vm10, %v3700_v33, %v2042_v38  ;;  %v2105_v3 = vsub.f32 %v3762_v31, %v2089_v49  ;;  %v1740_v22 = vsub.f32 0.6931472, %v3694_v50  ;;  %v1772_v13 = vmax.f32 %v3716_v52, 0.0 }
 0x410   : > { %v2074_v39 = vsub.f32 %v4278_v62, %v2058_v45  ;;  %v2468_v43 = vadd.f32 -0.9189385, %v1706_v9  ;;  %v2014_v33 = vadd.f32 1.0, %v3930_v11  ;;  %v1989_v42 = vmul.f32 0.6931472, %v2778_v54  ;;  %v4283_v54 = vld [vmem:[#allocation12_spill] sm:$0xff] }
 0x411   : > { %v2140_v5 = vsel %vm2112_vm5, %v2105_v3, 0.0  ;;  %v1992_v29 = vmul.f32 %v3871_v53, %v1991_v17  ;;  %vm1994_vm11 = vcmp.lt.f32.partialorder %v1993_v32, 0.0004427343  ;;  %v2000_v31 = vadd.f32 1.0, %v1999_v8  ;;  %v4282_v3 = vld [vmem:[#allocation21_spill] sm:$0xff] }
 0x412   : > { %v2090_v25 = vmul.f32 2.0, %v2074_v39  ;;  %2141 = vadd.xlane.f32.xlu0 %v2140_v5  ;;  %v2008_v55 = vmul.f32 -0.5, %v3906_v30  ;;  %2783 = vlog2.f32 %v2014_v33  ;;  %v2002_v19 = vand.u32 2147483647, %v3880_v57 }
 0x413   : > { %v1995_v56 = vsel %vm1994_vm11, %v1992_v29, %v1989_v42  ;;  %v2023_v37 = vadd.f32 1.0, %v3943_v51  ;;  %v1741_v2 = vsub.f32 0.6931472, %v3725_v35  ;;  %v1773_v23 = vmax.f32 %v3750_v15, 0.0 }
 0x414   : > { %v2106_v4 = vsub.f32 %v2468_v43, %v2090_v25  ;;  %v1707_v41 = vsub.f32 %v4279_v14, %v3771_v28  ;;  %v2043_v53 = vadd.f32 %v1995_v56, %v1771_v46  ;;  %v2780_v1 = vpop.eup %2779  ;;  %vm1803_vm12 = vcmp.ne.f32.partialorder %v4280_v59, %v4280_v59 }
 0x415   : > { %v2017_v47 = vmul.f32 -0.5, %v3930_v11  ;;  %2785 = vlog2.f32 %v2023_v37  ;;  %v1998_v63 = vmul.f32 0.6931472, %v2780_v1  ;;  %v2001_v20 = vmul.f32 %v3880_v57, %v2000_v31  ;;  %v4284_v31 = vld [vmem:[#allocation5_spill] sm:$0xff] }
 0x416   : > { %v2143_v36 = vsel %vm2112_vm5, %v2106_v4, 0.0  ;;  %v2059_v9 = vsel %vm1803_vm12, %v3704_v27, %v2043_v53  ;;  %v2009_v38 = vadd.f32 1.0, %v2008_v55  ;;  %vm2003_vm13 = vcmp.lt.f32.partialorder %v2002_v19, 0.0004427343  ;;  %v4285_v55 = vld [vmem:[#allocation22_spill] sm:$0xff] }
 0x417   : > { %2144 = vadd.xlane.f32.xlu1 %v2143_v36  ;;  %v2075_v49 = vsub.f32 %v1739_v16, %v2059_v9  ;;  %v2011_v28 = vand.u32 2147483647, %v3906_v30  ;;  %v2026_v17 = vmul.f32 -0.5, %v3943_v51  ;;  %v1742_v60 = vsub.f32 0.6931472, %v4281_v44  ;;  %v4287_v36 = vld [vmem:[#allocation3_spill] sm:$0xff] }
 0x418   : > { %v1774_v45 = vmax.f32 %v3769_v0, 0.0  ;;  %v2469_v32 = vadd.f32 -0.9189385, %v1707_v41  ;;  %v2004_v8 = vsel %vm2003_vm13, %v2001_v20, %v1998_v63  ;;  %v2782_v46 = vpop.eup %2781  ;;  %v1708_v27 = vsub.f32 %v4282_v3, %v3783_v12 }
 0x419   : > { %v2091_v62 = vmul.f32 2.0, %v2075_v49  ;;  %v2044_v39 = vadd.f32 %v2004_v8, %v1772_v13  ;;  %v2018_v57 = vadd.f32 1.0, %v2017_v47  ;;  %vm1804_vm14 = vcmp.ne.f32.partialorder %v4283_v54, %v4283_v54  ;;  %v4288_v49 = vld [vmem:[#allocation6_spill] sm:$0xff] }
 0x41a   : > { %v2007_v16 = vmul.f32 0.6931472, %v2782_v46  ;;  %v2010_v43 = vmul.f32 %v3906_v30, %v2009_v38  ;;  %v2020_v33 = vand.u32 2147483647, %v3930_v11  ;;  %vm2012_vm15 = vcmp.lt.f32.partialorder %v2011_v28, 0.0004427343 }
 0x41b   : > { %v2107_v5 = vsub.f32 %v2469_v32, %v2091_v62  ;;  %v2060_v25 = vsel %vm1804_vm14, %v3716_v52, %v2044_v39  ;;  %v2027_v42 = vadd.f32 1.0, %v2026_v17  ;;  %v1709_v12 = vsub.f32 %v4285_v55, %v4284_v31  ;;  %v4286_v52 = vld [vmem:[#allocation15_spill] sm:$0xff]  ;;  %v4290_v32 = vld [vmem:[#allocation4_spill] sm:$0xff]  ;;  %v4292_v62 = vld [vmem:[#allocation25_spill] sm:$0xff] }
 0x41c   : > { %v2784_v29 = vpop.eup %2783  ;;  %v2076_v4 = vsub.f32 %v1740_v22, %v2060_v25  ;;  %v2013_v13 = vsel %vm2012_vm15, %v2010_v43, %v2007_v16  ;;  %v2029_v56 = vand.u32 2147483647, %v3943_v51  ;;  %v2019_v30 = vmul.f32 %v3930_v11, %v2018_v57  ;;  %v4289_v28 = vld [vmem:[#allocation23_spill] sm:$0xff]  ;;  %v4293_v39 = vld [vmem:[#allocation24_spill] sm:$0xff] }
 0x41d   : > { %v2146_v19 = vsel %vm2112_vm5, %v2107_v5, 0.0  ;;  %v2045_v37 = vadd.f32 %v2013_v13, %v1773_v23  ;;  %v2016_v14 = vmul.f32 0.6931472, %v2784_v29  ;;  %v2470_v41 = vadd.f32 -0.9189385, %v1708_v27  ;;  %v4294_v16 = vld [vmem:[#allocation16_spill] sm:$0xff] }
 0x41e   : > { %2147 = vadd.xlane.f32.xlu0 %v2146_v19  ;;  %v2092_v53 = vmul.f32 2.0, %v2076_v4  ;;  %vm1805_vm1 = vcmp.ne.f32.partialorder %v4286_v52, %v4286_v52  ;;  %vm2021_vm2 = vcmp.lt.f32.partialorder %v2020_v33, 0.0004427343  ;;  %v1775_v59 = vmax.f32 %v4287_v36, 0.0  ;;  %v4295_v4 = vld [vmem:[#allocation8_spill] sm:$0xff] }
 0x41f   : > { %v2786_v1 = vpop.eup %2785  ;;  %v2061_v22 = vsel %vm1805_vm1, %v3750_v15, %v2045_v37  ;;  %v2022_v47 = vsel %vm2021_vm2, %v2019_v30, %v2016_v14  ;;  %v2028_v9 = vmul.f32 %v3943_v51, %v2027_v42  ;;  %v2471_v11 = vadd.f32 -0.9189385, %v1709_v12  ;;  %v4299_v30 = vld [vmem:[#allocation9_spill] sm:$0xff] }
 0x420   : > { %v2108_v63 = vsub.f32 %v2470_v41, %v2092_v53  ;;  %v2077_v23 = vsub.f32 %v1741_v2, %v2061_v22  ;;  %v2046_v20 = vadd.f32 %v2022_v47, %v1774_v45  ;;  %v2025_v38 = vmul.f32 0.6931472, %v2786_v1  ;;  %v4291_v2 = vld [vmem:[#allocation17_spill] sm:$0xff]  ;;  %v4300_v41 = vld [vmem:[#allocation10_spill] sm:$0xff]  ;;  %v4047_v53 = vpop.permute.xlu0 %2201  ;;  %v4049_v1 = vpop.permute.xlu1 %2203 }
 0x421   : > { %v1710_v17 = vsub.f32 %v4289_v28, %v4288_v49  ;;  %vm1806_vm3 = vcmp.ne.f32.partialorder %v4290_v32, %v4290_v32  ;;  %vm2030_vm4 = vcmp.lt.f32.partialorder %v2029_v56, 0.0004427343  ;;  %v1743_v45 = vsub.f32 0.6931472, %v4291_v2  ;;  %v4297_v56 = vld [vmem:[#allocation7_spill] sm:$0xff]  ;;  %v4304_v32 = vld [vmem:[#allocation29_spill] sm:$0xff] }
 0x422   : > { %v2149_v8 = vsel %vm2112_vm5, %v2108_v63, 0.0  ;;  %v2093_v46 = vmul.f32 2.0, %v2077_v23  ;;  %v2062_v15 = vsel %vm1806_vm3, %v3769_v0, %v2046_v20  ;;  %v2031_v3 = vsel %vm2030_vm4, %v2028_v9, %v2025_v38  ;;  %v4303_v20 = vld [vmem:[#allocation26_spill] sm:$0xff] }
 0x423   : > { %2150 = vadd.xlane.f32.xlu1 %v2149_v8  ;;  %v2078_v51 = vsub.f32 %v1742_v60, %v2062_v15  ;;  %v2047_v27 = vadd.f32 %v2031_v3, %v1775_v59  ;;  %v1711_v57 = vsub.f32 %v4293_v39, %v4292_v62  ;;  %vm1807_vm6 = vcmp.ne.f32.partialorder %v4294_v16, %v4294_v16  ;;  %v4302_v59 = vld [vmem:[#allocation27_spill] sm:$0xff]  ;;  %v4305_v3 = vld [vmem:[#allocation13_spill] sm:$0xff]  ;;  %v4306_v39 = vld [vmem:[#allocation18_spill] sm:$0xff] }
 0x424   : > { %v2109_v54 = vsub.f32 %v2471_v11, %v2093_v46  ;;  %v2472_v43 = vadd.f32 -0.9189385, %v1710_v17  ;;  %v4296_v13 = vclamps-f32 %v4295_v4, 9.0  ;;  %v4298_v19 = vclamps-f32 %v4297_v56, 9.0 }
 0x425   : > { %v2094_v33 = vmul.f32 2.0, %v2078_v51  ;;  %v2063_v5 = vsel %vm1807_vm6, %v4287_v36, %v2047_v27  ;;  %v2473_v60 = vadd.f32 -0.9189385, %v1711_v57  ;;  %vm2257_vm7 = vcmask 72704   ;;  %v4301_v36 = vld [vmem:[#allocation11_spill] sm:$0xff] }
 0x426   : > { %v2152_v25 = vsel %vm2112_vm5, %v2109_v54, 0.0  ;;  %v2079_v0 = vsub.f32 %v1743_v45, %v2063_v5  ;;  %2787 = vtanh.f32 %v4296_v13 }
 0x427   : > { %2153 = vadd.xlane.f32.xlu0 %v2152_v25  ;;  %v2110_v42 = vsub.f32 %v2472_v43, %v2094_v33  ;;  %2789 = vtanh.f32 %v4298_v19  ;;  %v4307_v43 = vld [vmem:[#allocation28_spill] sm:$0xff] }
 0x428   : > { %v2095_v29 = vmul.f32 2.0, %v2079_v0  ;;  %2791 = vtanh.f32 %v4299_v30 }
 0x429   : > { %v2155_v31 = vsel %vm2112_vm5, %v2110_v42, 0.0  ;;  %2793 = vtanh.f32 %v4300_v41 }
 0x42a   : > { %2156 = vadd.xlane.f32.xlu1 %v2155_v31  ;;  %v2111_v55 = vsub.f32 %v2473_v60, %v2095_v29  ;;  %2795 = vtanh.f32 %v4301_v36  ;;  %v4308_v29 = vld [vmem:[#allocation30_spill] sm:$0xff] }
 0x42b   : > { %2797 = vtanh.f32 %v4305_v3 }
 0x42c   : > { %v2158_v12 = vsel %vm2112_vm5, %v2111_v55, 0.0  ;;  %2799 = vtanh.f32 %v4306_v39 }
 0x42d   : > { %2159 = vadd.xlane.f32.xlu0 %v2158_v12  ;;  %2801 = vtanh.f32 %v3530_v58 }
 0x42e   : > { %2803 = vtanh.f32 %v3596_v26 }
 0x42f   : > { %2805 = vtanh.f32 %v3617_v21 }
 0x430   : > { %v2788_v37 = vpop.eup %2787  ;;  %2807 = vtanh.f32 %v3621_v7 }
 0x431   : > { %v2790_v14 = vpop.eup %2789  ;;  %2809 = vtanh.f32 %v3643_v48 }
 0x432   : > { %v2792_v52 = vpop.eup %2791  ;;  %2811 = vtanh.f32 %v3694_v50 }
 0x433   : > { %v2225_v22 = vsel %vm2112_vm5, %v2792_v52, %v4302_v59  ;;  %v2794_v63 = vpop.eup %2793  ;;  %2813 = vtanh.f32 %v3725_v35 }
 0x434   : > { %v2226_v38 = vsel %vm2112_vm5, %v2794_v63, %v4303_v20  ;;  %v2796_v17 = vpop.eup %2795  ;;  %2815 = vtanh.f32 %v4291_v2 }
 0x435   : > { %v2227_v8 = vsel %vm2112_vm5, %v2796_v17, %v4304_v32  ;;  %v2798_v27 = vpop.eup %2797  ;;  %2817 = vtanh.f32 %v4281_v44 }
 0x436   : > { %v2228_v45 = vsel %vm2112_vm5, %v2798_v27, %v3876_v34  ;;  %v2800_v16 = vpop.eup %2799 }
 0x437   : > { %v2229_v33 = vsel %vm2112_vm5, %v2800_v16, %v4307_v43  ;;  %v2802_v0 = vpop.eup %2801 }
 0x438   : > { %v2230_v58 = vsel %vm2112_vm5, %v2802_v0, %v3894_v24  ;;  %v2804_v60 = vpop.eup %2803 }
 0x439   : > { %v2231_v31 = vsel %vm2112_vm5, %v2804_v60, %v4308_v29  ;;  %v2806_v24 = vpop.eup %2805 }
 0x43a   : > { %v2232_v4 = vsel %vm2112_vm5, %v2806_v24, %v3924_v40  ;;  %v2808_v56 = vpop.eup %2807 }
 0x43b   : > { %2207 = vrot.lane.b32.xlu1 %v2788_v37, %s2829_s21  ;;  %v2233_v37 = vsel %vm2112_vm5, %v2808_v56, %v3884_v61  ;;  %v2810_v41 = vpop.eup %2809 }
 0x43c   : > { %v2234_v40 = vsel %vm2112_vm5, %v2810_v41, %v3941_v10  ;;  %v2812_v20 = vpop.eup %2811 }
 0x43d   : > { %v2814_v35 = vpop.eup %2813 }
 0x43e   : > { %v2816_v32 = vpop.eup %2815 }
 0x43f   : > { %v2818_v3 = vpop.eup %2817 }
 0x443   : > { %2205 = vrot.lane.b32.xlu0 %v2790_v14, %s2829_s21 }
 0x467   : > { %v2115_v47 = vpop.xlane.xlu0 %2114 }
 0x468   : > { %v2241_v9 = vsel %vm450_vm0, %v2225_v22, %v2115_v47 }
 0x469   : > { %v2258_v23 = vsel %vm2257_vm7, %v2241_v9, 0.0 }
 0x46a   : > { %2274 = vst [vmem:[%s4058_s28] sm:$0xff] %v2258_v23 }
 0x46c   : > { %v2118_v11 = vpop.xlane.xlu1 %2117 }
 0x46d   : > { %v2242_v49 = vsel %vm450_vm0, %v2226_v38, %v2118_v11 }
 0x46e   : > { %v2259_v28 = vsel %vm2257_vm7, %v2242_v49, 0.0 }
 0x46f   : > { %2275 = vst [vmem:[%s4058_s28 + $0x8] sm:$0xff] %v2259_v28 }
 0x473   : > { %v2121_v46 = vpop.xlane.xlu0 %2120 }
 0x474   : > { %v2243_v15 = vsel %vm450_vm0, %v2227_v8, %v2121_v46 }
 0x475   : > { %v2260_v51 = vsel %vm2257_vm7, %v2243_v15, 0.0 }
 0x476   : > { %2276 = vst [vmem:[%s4058_s28 + $0x10] sm:$0xff] %v2260_v51 }
 0x481   : > { %v2124_v62 = vpop.xlane.xlu0 %2123 }
 0x482   : > { %v2244_v57 = vsel %vm450_vm0, %v2228_v45, %v2124_v62 }
 0x483   : > { %v2261_v54 = vsel %vm2257_vm7, %v2244_v57, 0.0 }
 0x484   : > { %2277 = vst [vmem:[%s4058_s28 + $0x18] sm:$0xff] %v2261_v54 }
 0x48b   : > { %v2127_v5 = vpop.xlane.xlu1 %2126 }
 0x48c   : > { %v2245_v34 = vsel %vm450_vm0, %v2229_v33, %v2127_v5 }
 0x48d   : > { %v2262_v25 = vsel %vm2257_vm7, %v2245_v34, 0.0 }
 0x48e   : > { %2278 = vst [vmem:[%s4058_s28 + $0x20] sm:$0xff] %v2262_v25 }
 0x491   : > { %v2130_v26 = vpop.xlane.xlu0 %2129 }
 0x492   : > { %v2246_v42 = vsel %vm450_vm0, %v2230_v58, %v2130_v26 }
 0x493   : > { %v2263_v21 = vsel %vm2257_vm7, %v2246_v42, 0.0 }
 0x494   : > { %2279 = vst [vmem:[%s4058_s28 + $0x28] sm:$0xff] %v2263_v21  ;;  %v2133_v55 = vpop.xlane.xlu1 %2132 }
 0x495   : > { %v2247_v12 = vsel %vm450_vm0, %v2231_v31, %v2133_v55 }
 0x496   : > { %v2264_v7 = vsel %vm2257_vm7, %v2247_v12, 0.0 }
 0x497   : > { %2280 = vst [vmem:[%s4058_s28 + $0x30] sm:$0xff] %v2264_v7 }
 0x49a   : > { %v2136_v13 = vpop.xlane.xlu0 %2135 }
 0x49b   : > { %v2248_v48 = vsel %vm450_vm0, %v2232_v4, %v2136_v13  ;;  %v2139_v14 = vpop.xlane.xlu1 %2138 }
 0x49c   : > { %v2265_v19 = vsel %vm2257_vm7, %v2248_v48, 0.0  ;;  %v2249_v30 = vsel %vm450_vm0, %v2233_v37, %v2139_v14 }
 0x49d   : > { %2281 = vst [vmem:[%s4058_s28 + $0x38] sm:$0xff] %v2265_v19  ;;  %v2266_v52 = vsel %vm2257_vm7, %v2249_v30, 0.0 }
 0x49e   : > { %2282 = vst [vmem:[%s4058_s28 + $0x40] sm:$0xff] %v2266_v52 }
 0x49f   : > { %v2142_v36 = vpop.xlane.xlu0 %2141 }
 0x4a0   : > { %v2250_v59 = vsel %vm450_vm0, %v2234_v40, %v2142_v36 }
 0x4a1   : > { %v2267_v22 = vsel %vm2257_vm7, %v2250_v59, 0.0 }
 0x4a2   : > { %2283 = vst [vmem:[%s4058_s28 + $0x48] sm:$0xff] %v2267_v22 }
 0x4a4   : > { %v2145_v61 = vpop.xlane.xlu1 %2144 }
 0x4a5   : > { %v2251_v47 = vsel %vm450_vm0, %v3914_v6, %v2145_v61  ;;  %v2237_v6 = vsel %vm2112_vm5, %v2812_v20, %v4047_v53 }
 0x4a6   : > { %v2268_v9 = vsel %vm2257_vm7, %v2251_v47, 0.0 }
 0x4a7   : > { %2284 = vst [vmem:[%s4058_s28 + $0x50] sm:$0xff] %v2268_v9 }
 0x4ab   : > { %v2148_v10 = vpop.xlane.xlu0 %2147 }
 0x4ac   : > { %v2252_v63 = vsel %vm450_vm0, %v3974_v18, %v2148_v10  ;;  %v2238_v18 = vsel %vm2112_vm5, %v2814_v35, %v4049_v1 }
 0x4ad   : > { %v2269_v23 = vsel %vm2257_vm7, %v2252_v63, 0.0 }
 0x4ae   : > { %2285 = vst [vmem:[%s4058_s28 + $0x58] sm:$0xff] %v2269_v23 }
 0x4b0   : > { %v2151_v38 = vpop.xlane.xlu1 %2150 }
 0x4b1   : > { %v2253_v50 = vsel %vm450_vm0, %v2237_v6, %v2151_v38 }
 0x4b2   : > { %v2270_v11 = vsel %vm2257_vm7, %v2253_v50, 0.0 }
 0x4b3   : > { %2286 = vst [vmem:[%s4058_s28 + $0x60] sm:$0xff] %v2270_v11 }
 0x4b4   : > { %v2154_v49 = vpop.xlane.xlu0 %2153 }
 0x4b5   : > { %v2254_v28 = vsel %vm450_vm0, %v2238_v18, %v2154_v49 }
 0x4b6   : > { %v2271_v53 = vsel %vm2257_vm7, %v2254_v28, 0.0 }
 0x4b7   : > { %2287 = vst [vmem:[%s4058_s28 + $0x68] sm:$0xff] %v2271_v53  ;;  %v2157_v2 = vpop.xlane.xlu1 %2156 }
 0x4ba   : > { %v2160_v17 = vpop.xlane.xlu0 %2159 }
 0x4bb   : > { %v2208_v8 = vpop.permute.xlu1 %2207 }
 0x4bc   : > { %v2240_v46 = vsel %vm2112_vm5, %v2816_v32, %v2208_v8 }
 0x4bd   : > { %v2256_v15 = vsel %vm450_vm0, %v2240_v46, %v2160_v17 }
 0x4be   : > { %v2273_v44 = vsel %vm2257_vm7, %v2256_v15, 0.0  ;;  %v2206_v51 = vpop.permute.xlu0 %2205 }
 0x4bf   : > { %2289 = vst [vmem:[%s4058_s28 + $0x78] sm:$0xff] %v2273_v44  ;;  %v2239_v1 = vsel %vm2112_vm5, %v2818_v3, %v2206_v51 }
 0x4c0   : > { %v2255_v27 = vsel %vm450_vm0, %v2239_v1, %v2157_v2 }
 0x4c1   : > { %v2272_v45 = vsel %vm2257_vm7, %v2255_v27, 0.0 }
 0x4c2   : > { %2288 = vst [vmem:[%s4058_s28 + $0x70] sm:$0xff] %v2272_v45 }
 0x4c3 PF: > { %s18_s27 = sadd.s32 1, %s2825_s27  }
 0x4c4   : > { %p15_p4 = scmp.ge.s32.totalorder %s18_s27, 4  }
 0x4c6   :  { %17 = sbr.rel (!%p15_p4) target bundleno = 1 (0x1), region = 88 }

</bundles_post_ra>
